<compile_context>
chip_gen: v6e
topology: v6e:2x2x1
jax: 0.10.0
libtpu: 0.0.40
codegen_flags: <defaults>
</compile_context>

<pallas_src>
import jax
import jax.numpy as jnp
from jax.experimental import pallas as pl
from jax.experimental.pallas import tpu as pltpu


def _clapool_kernel(x_ref, w_ref, b_ref, o_ref):
    # x_ref: (Bp, D)      bf16  -- flattened, zero-padded image batch
    # w_ref: (D, N*Cp)    bf16  -- all classifiers' (zero-padded) weights, fused
    # b_ref: (1, N*Cp)    f32   -- all classifiers' (zero-padded) biases, fused
    # o_ref: (Bp, N*Cp)   f32   -- fused prediction slab (lane-dense, 128-multiple)
    pred = jnp.dot(x_ref[...], w_ref[...],
                   preferred_element_type=jnp.float32)   # single MXU matmul, f32 acc
    o_ref[...] = pred + b_ref[...]                        # bias broadcast (1,NCp)->(Bp,NCp)


def make_clapool(weights, biases):
    """One-time setup (the ClaPool.__init__ analogue).

    weights: (N, D, n_classes) f32, biases: (N, n_classes) f32.
    Builds the fused, class-padded, bf16-at-rest weight slab ONCE and returns
    (forward_fn, w_fused, b_fused). forward_fn(images, w_fused, b_fused)
    returns (B, N, n_classes) == torch.stack(responses, dim=1).
    """
    N, D, C = weights.shape
    Cp = ((C + 127) // 128) * 128          # pad class dim to a lane multiple
    NCp = N * Cp

    # One-time layout prep: (N, D, C) -> zero-pad classes -> (D, N*Cp) bf16.
    # Zero pad columns are sliced off after the kernel, so they never leak.
    w_fused = jnp.transpose(jnp.pad(weights, ((0, 0), (0, 0), (0, Cp - C))),
                            (1, 0, 2)).reshape(D, NCp).astype(jnp.bfloat16)
    b_fused = jnp.pad(biases, ((0, 0), (0, Cp - C))).reshape(1, NCp).astype(jnp.float32)
    w_fused = jax.device_put(w_fused)      # bf16 at rest on device
    b_fused = jax.device_put(b_fused)

    @jax.jit
    def forward(images, w_fused, b_fused):
        B = images.shape[0]
        Bp = pl.cdiv(B, 16) * 16           # pad M to the bf16 sublane tile (>= f32 tile of 8)
        x = images.reshape(B, D).astype(jnp.bfloat16)
        x = jnp.pad(x, ((0, Bp - B), (0, 0)))          # padded rows are zero -> output = bias

        cost = pl.CostEstimate(
            flops=2 * Bp * D * NCp,
            transcendentals=0,
            bytes_accessed=D * NCp * 2 + Bp * D * 2 + NCp * 4 + Bp * NCp * 4)

        out = pl.pallas_call(
            _clapool_kernel,
            out_shape=jax.ShapeDtypeStruct((Bp, NCp), jnp.float32),
            grid_spec=pltpu.PrefetchScalarGridSpec(
                num_scalar_prefetch=0,
                grid=(1,),                                       # single fused step
                in_specs=[
                    pl.BlockSpec((Bp, D), lambda i: (0, 0)),     # full (padded) image batch
                    pl.BlockSpec((D, NCp), lambda i: (0, 0)),    # all fused weights
                    pl.BlockSpec((1, NCp), lambda i: (0, 0)),    # all fused biases
                ],
                out_specs=pl.BlockSpec((Bp, NCp), lambda i: (0, 0)),
            ),
            compiler_params=pltpu.CompilerParams(
                dimension_semantics=("arbitrary",)),
            cost_estimate=cost,
        )(x, w_fused, b_fused)

        # (Bp, N*Cp) -> (Bp, N, Cp) -> drop padded rows & zero-padded classes
        return out.reshape(Bp, N, Cp)[:B, :, :C]

    return forward, w_fused, b_fused


if __name__ == "__main__":
    # Shapes implied by the module: config.dataset_image_shape = [3, 32, 32],
    # config.n_classes = 100; small batch and a small classifier pool.
    B, C_in, H, W = 2, 3, 32, 32
    N_CLASSIFIERS = 3
    N_CLASSES = 100
    D = C_in * H * W

    key = jax.random.PRNGKey(0)
    k_img, k_w, k_b = jax.random.split(key, 3)

    images = jax.random.normal(k_img, (B, C_in, H, W), dtype=jnp.float32)
    weights = 0.02 * jax.random.normal(k_w, (N_CLASSIFIERS, D, N_CLASSES),
                                       dtype=jnp.float32)
    biases = 0.01 * jax.random.normal(k_b, (N_CLASSIFIERS, N_CLASSES),
                                      dtype=jnp.float32)

    # One-time prep (hoisted out of the per-call hot path).
    forward, w_fused, b_fused = make_clapool(weights, biases)

    responses = forward(images, w_fused, b_fused)
    responses = jax.block_until_ready(responses)

    # Reference check (pure JAX, f32). Tolerance loosened because x and W are
    # fed to the MXU in bf16 (f32 accumulation).
    x_flat = images.reshape(B, D)
    ref = jnp.stack(
        [x_flat @ weights[i] + biases[i] for i in range(N_CLASSIFIERS)], axis=1)
    assert responses.shape == (B, N_CLASSIFIERS, N_CLASSES), responses.shape
    assert jnp.allclose(responses, ref, atol=5e-2, rtol=5e-2), (
        float(jnp.max(jnp.abs(responses - ref))))

    print("KERNEL_OK")
</pallas_src>

<mosaic_0001>
module attributes {stable_mosaic.version = 11 : i64} {
  func.func @_clapool_kernel(%arg0: i32, %arg1: memref<16x3072xbf16, #tpu.memory_space<vmem>>, %arg2: memref<3072x384xbf16, #tpu.memory_space<vmem>>, %arg3: memref<1x384xf32, #tpu.memory_space<vmem>>, %arg4: memref<16x384xf32, #tpu.memory_space<vmem>>) attributes {dimension_semantics = [#tpu.dimension_semantics<arbitrary>], iteration_bounds = array<i64: 1>, scalar_prefetch = 0 : i64, scratch_operands = 0 : i64, tpu.core_type = #tpu.core_type<tc>, window_params = [{pipeline_mode = #tpu.pipeline_mode<synchronous>, transform_indices = @transform_0, window_bounds = array<i64: 16, 3072>}, {pipeline_mode = #tpu.pipeline_mode<synchronous>, transform_indices = @transform_1, window_bounds = array<i64: 3072, 384>}, {pipeline_mode = #tpu.pipeline_mode<synchronous>, transform_indices = @transform_2, window_bounds = array<i64: 1, 384>}, {pipeline_mode = #tpu.pipeline_mode<synchronous>, transform_indices = @transform_3, window_bounds = array<i64: 16, 384>}]} {
    %c0 = arith.constant 0 : index
    %c0_0 = arith.constant 0 : index
    %0 = vector.load %arg1[%c0, %c0_0] : memref<16x3072xbf16, #tpu.memory_space<vmem>>, vector<16x3072xbf16>
    %c0_1 = arith.constant 0 : index
    %c0_2 = arith.constant 0 : index
    %1 = vector.load %arg2[%c0_1, %c0_2] : memref<3072x384xbf16, #tpu.memory_space<vmem>>, vector<3072x384xbf16>
    %cst = arith.constant dense<0.000000e+00> : vector<16x384xf32>
    %2 = tpu.matmul %0, %1, %cst {dimension_numbers = #tpu.dot_dimension_numbers<[1], [0], [0], [1], [0, 0, 1, 1], [], []>} : vector<16x3072xbf16>, vector<3072x384xbf16>, vector<16x384xf32> -> vector<16x384xf32>
    %c0_3 = arith.constant 0 : index
    %c0_4 = arith.constant 0 : index
    %3 = vector.load %arg3[%c0_3, %c0_4] : memref<1x384xf32, #tpu.memory_space<vmem>>, vector<1x384xf32>
    %4 = vector.broadcast %3 : vector<1x384xf32> to vector<16x384xf32>
    %5 = arith.addf %2, %4 : vector<16x384xf32>
    %c0_5 = arith.constant 0 : index
    %c0_6 = arith.constant 0 : index
    %6 = vector.load %arg4[%c0_5, %c0_6] : memref<16x384xf32, #tpu.memory_space<vmem>>, vector<16x384xf32>
    tpu.vector_store %arg4[%c0_5, %c0_6], %5 {strides = array<i32>} : memref<16x384xf32, #tpu.memory_space<vmem>>, vector<16x384xf32>,
    return
  }
  func.func @transform_0(%arg0: i32) -> (i32, i32) {
    %c0_i32 = arith.constant 0 : i32
    %c0_i32_0 = arith.constant 0 : i32
    %c0_i32_1 = arith.constant 0 : i32
    return %c0_i32, %c0_i32_0 : i32, i32
  }
  func.func @transform_1(%arg0: i32) -> (i32, i32) {
    %c0_i32 = arith.constant 0 : i32
    %c0_i32_0 = arith.constant 0 : i32
    %c0_i32_1 = arith.constant 0 : i32
    return %c0_i32, %c0_i32_0 : i32, i32
  }
  func.func @transform_2(%arg0: i32) -> (i32, i32) {
    %c0_i32 = arith.constant 0 : i32
    %c0_i32_0 = arith.constant 0 : i32
    %c0_i32_1 = arith.constant 0 : i32
    return %c0_i32, %c0_i32_0 : i32, i32
  }
  func.func @transform_3(%arg0: i32) -> (i32, i32) {
    %c0_i32 = arith.constant 0 : i32
    %c0_i32_0 = arith.constant 0 : i32
    %c0_i32_1 = arith.constant 0 : i32
    return %c0_i32, %c0_i32_0 : i32, i32
  }
}

</mosaic_0001>

<bundles_post_ra>
// kernel: forward.1
= control target key start
LH: loop header
LB: loop body
LE: loop exit
PB: predicated region body
PF: predicated region fallthrough
CT: control target
= control target key end

     0   :  { %8 = vsyncpa [#allocation3], 0  ;;  %s7129_s0 = inlined_call_operand.vmem [shape: bf16[16,3072], index: 0, kind: input, shape index: {}]   ;;  %s7130_s1 = inlined_call_operand.hbm [shape: bf16[3072,384], index: 1, kind: input, shape index: {}]   ;;  %s7131_s2 = inlined_call_operand.hbm [shape: f32[1,384], index: 2, kind: input, shape index: {}]   ;;  %s7132_s3 = inlined_call_operand.vmem [shape: f32[16,384], index: 3, kind: output, shape index: {}]  }
   0x1   :  { %9 = vsyncpa [#allocation5], 0  ;;  %s6742_s12 = smov [#allocation2]  }
   0x2   :  { %s17_s13 = sshll.u32 %s6742_s12, 4  ;;  %s18_s13 = int_to_ptr.vmem [resolvable:$true] %s17_s13 }
   0x3   :  { %s6706_s14 = scalar_lea.vmem %s18_s13, 73728  ;;  %p6711_p1 = scmp.lt.s32.totalorder %s18_s13, %s18_s13 }
   0x4   :  { %p6707_p0 = scmp.ne.s32.totalorder %s18_s13, %s6706_s14  ;;  %p6712_p2 = scmp.lt.s32.totalorder %s6706_s14, %s6706_s14 }
   0x6   :  { %p6713_p3 = por %p6712_p2, %p6711_p1 }
   0x8   :  { %p6714_p4 = pnand %p6713_p3, %p6707_p0 }
   0xa   :  { %6717 = shalt.err (!%p6714_p4)
}
   0xb   :  { %s6743_s15 = smov 192   ;;  %s6744_s16 = smov 12  }
   0xc   :  { %23 = dma.hbm_to_vmem [thread:$0]  %s7130_s1, 73728, %s18_s13, [#allocation3], %s6743_s15, %s6743_s15, %s6744_s16  }
   0xd   :  { %s6745_s19 = smov [#allocation4]  }
   0xe   :  { %s30_s20 = sshll.u32 %s6745_s19, 4  ;;  %s31_s20 = int_to_ptr.vmem [resolvable:$true] %s30_s20 }
   0xf   :  { %s6726_s21 = scalar_lea.vmem %s31_s20, 48  ;;  %s6730_s22 = scalar_lea.vmem %s31_s20, 64 }
  0x10   :  { %p6727_p5 = scmp.ne.s32.totalorder %s31_s20, %s6726_s21  ;;  %p6731_p6 = scmp.lt.s32.totalorder %s31_s20, %s31_s20 }
  0x11   :  { %p6732_p7 = scmp.lt.s32.totalorder %s6730_s22, %s6726_s21 }
  0x13   :  { %p6733_p8 = por %p6732_p7, %p6731_p6 }
  0x15   :  { %p6734_p9 = pnand %p6733_p8, %p6727_p5 }
  0x17   :  { %6737 = shalt.err (!%p6734_p9)
}
  0x18   :  { %33 = dma.hbm_to_vmem [thread:$0]  %s7131_s2, 48, %s31_s20, [#allocation5]  }
  0x19   :  { %6738 = dma.done.wait [#allocation3], 73728  }
  0x1a   :  { %6739 = vsyncadd [#allocation3], 4294893568 }
  0x1b   :  { %6740 = dma.done.wait [#allocation5], 48  }
  0x1c   :  { %6741 = vsyncadd [#allocation5], 4294967248  ;;  %v5930_v0 = vld [vmem:[#allocation2 + $0xac] ss:$12 sps:$4 sm:$0xff]   ;;  %v5934_v2 = vld [vmem:[#allocation2 + $0xa8] ss:$12 sps:$4 sm:$0xff]  }
  0x1d   :  { %v5932_v1 = vld [vmem:[#allocation2 + $0x22c] ss:$12 sps:$4 sm:$0xff]   ;;  %4042 = vmatprep.subr.bf16.mxu0 %v5930_v0  ;;  %v5935_v3 = vld [vmem:[#allocation2 + $0x228] ss:$12 sps:$4 sm:$0xff]   ;;  %v5940_v6 = vld [vmem:[#allocation2 + $0x90] ss:$12 sps:$4 sm:$0xff]  }
  0x1e   :  { %4085 = vmatprep.subr.bf16.mxu1 %v5932_v1  ;;  %v5936_v4 = vld [vmem:[#allocation2 + $0x94] ss:$12 sps:$4 sm:$0xff]   ;;  %4043 = vmatpush1.bf16.msra.mxu0 %v5934_v2  ;;  %v5941_v7 = vld [vmem:[#allocation2 + $0x210] ss:$12 sps:$4 sm:$0xff]   ;;  %v5946_v10 = vld [vmem:[#allocation2 + $0x78] ss:$12 sps:$4 sm:$0xff]  }
  0x1f   :  { %4086 = vmatpush1.bf16.msra.mxu1 %v5935_v3  ;;  %v5938_v5 = vld [vmem:[#allocation2 + $0x214] ss:$12 sps:$4 sm:$0xff]   ;;  %4044 = vmatprep.subr.bf16.mxu0 %v5936_v4  ;;  %v5942_v8 = vld [vmem:[#allocation2 + $0x7c] ss:$12 sps:$4 sm:$0xff]   ;;  %v5947_v11 = vld [vmem:[#allocation2 + $0x1f8] ss:$12 sps:$4 sm:$0xff]  }
  0x20   :  { %4087 = vmatprep.subr.bf16.mxu1 %v5938_v5  ;;  %v5944_v9 = vld [vmem:[#allocation2 + $0x1fc] ss:$12 sps:$4 sm:$0xff]   ;;  %v5948_v12 = vld [vmem:[#allocation2 + $0x64] ss:$12 sps:$4 sm:$0xff]   ;;  %v5952_v14 = vld [vmem:[#allocation2 + $0x60] ss:$12 sps:$4 sm:$0xff]  }
  0x21   :  { %v5950_v13 = vld [vmem:[#allocation2 + $0x1e4] ss:$12 sps:$4 sm:$0xff]   ;;  %v5953_v15 = vld [vmem:[#allocation2 + $0x1e0] ss:$12 sps:$4 sm:$0xff]   ;;  %v5958_v18 = vld [vmem:[#allocation2 + $0x48] ss:$12 sps:$4 sm:$0xff]  }
  0x22   :  { %4045 = vmatpush1.bf16.msra.mxu0 %v5940_v6  ;;  %v5954_v16 = vld [vmem:[#allocation2 + $0x4c] ss:$12 sps:$4 sm:$0xff]   ;;  %v5959_v19 = vld [vmem:[#allocation2 + $0x1c8] ss:$12 sps:$4 sm:$0xff]   ;;  %v5964_v22 = vld [vmem:[#allocation2 + $0x30] ss:$12 sps:$4 sm:$0xff]  }
  0x23   :  { %4088 = vmatpush1.bf16.msra.mxu1 %v5941_v7  ;;  %4046 = vmatprep.subr.bf16.mxu0 %v5942_v8  ;;  %v5956_v17 = vld [vmem:[#allocation2 + $0x1cc] ss:$12 sps:$4 sm:$0xff]   ;;  %v5960_v20 = vld [vmem:[#allocation2 + $0x34] ss:$12 sps:$4 sm:$0xff]   ;;  %v5965_v23 = vld [vmem:[#allocation2 + $0x1b0] ss:$12 sps:$4 sm:$0xff]  }
  0x24   :  { %4089 = vmatprep.subr.bf16.mxu1 %v5944_v9  ;;  %v5962_v21 = vld [vmem:[#allocation2 + $0x1b4] ss:$12 sps:$4 sm:$0xff]   ;;  %v5966_v24 = vld [vmem:[#allocation2 + $0x1c] ss:$12 sps:$4 sm:$0xff]   ;;  %v5970_v26 = vld [vmem:[#allocation2 + $0x18] ss:$12 sps:$4 sm:$0xff]  }
  0x25   :  { %v5968_v25 = vld [vmem:[#allocation2 + $0x19c] ss:$12 sps:$4 sm:$0xff]   ;;  %v5971_v27 = vld [vmem:[#allocation2 + $0x198] ss:$12 sps:$4 sm:$0xff]   ;;  %v5976_v30 = vld [vmem:[#allocation2] ss:$12 sps:$4 sm:$0xff]  }
  0x26   :  { %4047 = vmatpush1.bf16.msra.mxu0 %v5946_v10  ;;  %v5972_v28 = vld [vmem:[#allocation2 + $0x4] ss:$12 sps:$4 sm:$0xff]   ;;  %v5977_v31 = vld [vmem:[#allocation2 + $0x180] ss:$12 sps:$4 sm:$0xff]   ;;  %v5982_v34 = vld [vmem:[#allocation2 + $0x168] ss:$12 sps:$4 sm:$0xff]  }
  0x27   :  { %4090 = vmatpush1.bf16.msra.mxu1 %v5947_v11  ;;  %4048 = vmatprep.subr.bf16.mxu0 %v5948_v12  ;;  %v5974_v29 = vld [vmem:[#allocation2 + $0x184] ss:$12 sps:$4 sm:$0xff]   ;;  %v5978_v32 = vld [vmem:[#allocation2 + $0x16c] ss:$12 sps:$4 sm:$0xff]   ;;  %v5983_v35 = vld [vmem:[#allocation2 + $0x2e8] ss:$12 sps:$4 sm:$0xff]  }
  0x28   :  { %4091 = vmatprep.subr.bf16.mxu1 %v5950_v13  ;;  %v5980_v33 = vld [vmem:[#allocation2 + $0x2ec] ss:$12 sps:$4 sm:$0xff]   ;;  %v5984_v36 = vld [vmem:[#allocation2 + $0x154] ss:$12 sps:$4 sm:$0xff]   ;;  %v5988_v38 = vld [vmem:[#allocation2 + $0x150] ss:$12 sps:$4 sm:$0xff]  }
  0x29   :  { %v5986_v37 = vld [vmem:[#allocation2 + $0x2d4] ss:$12 sps:$4 sm:$0xff]   ;;  %v5989_v39 = vld [vmem:[#allocation2 + $0x2d0] ss:$12 sps:$4 sm:$0xff]   ;;  %v5994_v42 = vld [vmem:[#allocation2 + $0x138] ss:$12 sps:$4 sm:$0xff]  }
  0x2a   :  { %4049 = vmatpush1.bf16.msra.mxu0 %v5952_v14  ;;  %v5990_v40 = vld [vmem:[#allocation2 + $0x13c] ss:$12 sps:$4 sm:$0xff]   ;;  %v5995_v43 = vld [vmem:[#allocation2 + $0x2b8] ss:$12 sps:$4 sm:$0xff]   ;;  %v6000_v46 = vld [vmem:[#allocation2 + $0x120] ss:$12 sps:$4 sm:$0xff]  }
  0x2b   :  { %4092 = vmatpush1.bf16.msra.mxu1 %v5953_v15  ;;  %4050 = vmatprep.subr.bf16.mxu0 %v5954_v16  ;;  %v5992_v41 = vld [vmem:[#allocation2 + $0x2bc] ss:$12 sps:$4 sm:$0xff]   ;;  %v5996_v44 = vld [vmem:[#allocation2 + $0x124] ss:$12 sps:$4 sm:$0xff]   ;;  %v6001_v47 = vld [vmem:[#allocation2 + $0x2a0] ss:$12 sps:$4 sm:$0xff]  }
  0x2c   :  { %4093 = vmatprep.subr.bf16.mxu1 %v5956_v17  ;;  %v5998_v45 = vld [vmem:[#allocation2 + $0x2a4] ss:$12 sps:$4 sm:$0xff]   ;;  %v42_v50 = vld [vmem:[%s7129_s0 + $0x8] sm:$0xff]  ;;  %v6008_v58 = vld [vmem:[#allocation2 + $0xf4] ss:$12 sps:$4 sm:$0xff]  }
  0x2d   :  { %v41_v48 = vld [vmem:[%s7129_s0] sm:$0xff]  ;;  %v54_v51 = vld [vmem:[%s7129_s0 + $0x68] sm:$0xff]  ;;  %v6012_v60 = vld [vmem:[#allocation2 + $0xf0] ss:$12 sps:$4 sm:$0xff]  }
  0x2e   :  { %4051 = vmatpush1.bf16.msra.mxu0 %v5958_v18  ;;  %v53_v49 = vld [vmem:[%s7129_s0 + $0x60] sm:$0xff]  ;;  %v6002_v52 = vld [vmem:[#allocation2 + $0x10c] ss:$12 sps:$4 sm:$0xff]   ;;  %v6786_v55 = vcombine.high %v42_v50, %v54_v51  ;;  %v6006_v56 = vld [vmem:[#allocation2 + $0x108] ss:$12 sps:$4 sm:$0xff]   ;;  %v6792_v9 = vcombine.low %v42_v50, %v54_v51 }
  0x2f   :  { %4094 = vmatpush1.bf16.msra.mxu1 %v5959_v19  ;;  %4052 = vmatprep.subr.bf16.mxu0 %v5960_v20  ;;  %v6784_v53 = vcombine.high %v41_v48, %v53_v49  ;;  %v6004_v54 = vld [vmem:[#allocation2 + $0x28c] ss:$12 sps:$4 sm:$0xff]   ;;  %v6007_v57 = vld [vmem:[#allocation2 + $0x288] ss:$12 sps:$4 sm:$0xff]   ;;  %v6013_v61 = vld [vmem:[#allocation2 + $0x270] ss:$12 sps:$4 sm:$0xff]   ;;  %v6790_v8 = vcombine.low %v41_v48, %v53_v49 }
  0x30   :  { %4095 = vmatprep.subr.bf16.mxu1 %v5962_v21  ;;  %4117 = vmatprep.mubr.bf16.mxu1 %v6786_v55  ;;  %v6010_v59 = vld [vmem:[#allocation2 + $0x274] ss:$12 sps:$4 sm:$0xff]   ;;  %v6014_v62 = vld [vmem:[#allocation2 + $0xdc] ss:$12 sps:$4 sm:$0xff]   ;;  %v6018_v0 = vld [vmem:[#allocation2 + $0xd8] ss:$12 sps:$4 sm:$0xff]  }
  0x31   :  { %4074 = vmatprep.mubr.bf16.mxu0 %v6784_v53  ;;  %v6016_v63 = vld [vmem:[#allocation2 + $0x25c] ss:$12 sps:$4 sm:$0xff]   ;;  %v6019_v1 = vld [vmem:[#allocation2 + $0x258] ss:$12 sps:$4 sm:$0xff]   ;;  %v6024_v4 = vld [vmem:[#allocation2 + $0xc0] ss:$12 sps:$4 sm:$0xff]  }
  0x32   :  { %4053 = vmatpush1.bf16.msra.mxu0 %v5964_v22  ;;  %v6020_v2 = vld [vmem:[#allocation2 + $0xc4] ss:$12 sps:$4 sm:$0xff]   ;;  %v6025_v5 = vld [vmem:[#allocation2 + $0x240] ss:$12 sps:$4 sm:$0xff]   ;;  %v6026_v10 = vld [vmem:[#allocation2 + $0x3a8] ss:$12 sps:$4 sm:$0xff]  }
  0x33   :  { %4096 = vmatpush1.bf16.msra.mxu1 %v5965_v23  ;;  %4054 = vmatprep.subr.bf16.mxu0 %v5966_v24  ;;  %v6022_v3 = vld [vmem:[#allocation2 + $0x244] ss:$12 sps:$4 sm:$0xff]   ;;  %v6028_v6 = vld [vmem:[#allocation2 + $0x3ac] ss:$12 sps:$4 sm:$0xff]   ;;  %v6029_v11 = vld [vmem:[#allocation2 + $0x528] ss:$12 sps:$4 sm:$0xff]  }
  0x34   :  { %4097 = vmatprep.subr.bf16.mxu1 %v5968_v25  ;;  %v6031_v7 = vld [vmem:[#allocation2 + $0x52c] ss:$12 sps:$4 sm:$0xff]   ;;  %v6034_v12 = vld [vmem:[#allocation2 + $0x394] ss:$12 sps:$4 sm:$0xff]   ;;  %v6032_v14 = vld [vmem:[#allocation2 + $0x390] ss:$12 sps:$4 sm:$0xff]  }
  0x35   :  { %v6037_v13 = vld [vmem:[#allocation2 + $0x514] ss:$12 sps:$4 sm:$0xff]   ;;  %v6035_v15 = vld [vmem:[#allocation2 + $0x510] ss:$12 sps:$4 sm:$0xff]   ;;  %v6038_v18 = vld [vmem:[#allocation2 + $0x378] ss:$12 sps:$4 sm:$0xff]  }
  0x36   :  { %4055 = vmatpush1.bf16.msra.mxu0 %v5970_v26  ;;  %v6040_v16 = vld [vmem:[#allocation2 + $0x37c] ss:$12 sps:$4 sm:$0xff]   ;;  %v6041_v19 = vld [vmem:[#allocation2 + $0x4f8] ss:$12 sps:$4 sm:$0xff]   ;;  %v6044_v22 = vld [vmem:[#allocation2 + $0x360] ss:$12 sps:$4 sm:$0xff]  }
  0x37   :  { %4098 = vmatpush1.bf16.msra.mxu1 %v5971_v27  ;;  %4056 = vmatprep.subr.bf16.mxu0 %v5972_v28  ;;  %v6043_v17 = vld [vmem:[#allocation2 + $0x4fc] ss:$12 sps:$4 sm:$0xff]   ;;  %v6046_v20 = vld [vmem:[#allocation2 + $0x364] ss:$12 sps:$4 sm:$0xff]   ;;  %v6047_v23 = vld [vmem:[#allocation2 + $0x4e0] ss:$12 sps:$4 sm:$0xff]  }
  0x38   :  { %4099 = vmatprep.subr.bf16.mxu1 %v5974_v29  ;;  %v6049_v21 = vld [vmem:[#allocation2 + $0x4e4] ss:$12 sps:$4 sm:$0xff]   ;;  %v6052_v24 = vld [vmem:[#allocation2 + $0x34c] ss:$12 sps:$4 sm:$0xff]   ;;  %v6050_v26 = vld [vmem:[#allocation2 + $0x348] ss:$12 sps:$4 sm:$0xff]  }
  0x39   :  { %v6055_v25 = vld [vmem:[#allocation2 + $0x4cc] ss:$12 sps:$4 sm:$0xff]   ;;  %v6053_v27 = vld [vmem:[#allocation2 + $0x4c8] ss:$12 sps:$4 sm:$0xff]  }
  0x3a   :  { %4057 = vmatpush1.bf16.msra.mxu0 %v5976_v30  ;;  %v6058_v28 = vld [vmem:[#allocation2 + $0x334] ss:$12 sps:$4 sm:$0xff]   ;;  %v6056_v30 = vld [vmem:[#allocation2 + $0x330] ss:$12 sps:$4 sm:$0xff]  }
  0x3b   :  { %4100 = vmatpush1.bf16.msra.mxu1 %v5977_v31  ;;  %4058 = vmatprep.subr.bf16.mxu0 %v5978_v32  ;;  %v6061_v29 = vld [vmem:[#allocation2 + $0x4b4] ss:$12 sps:$4 sm:$0xff]   ;;  %v6059_v31 = vld [vmem:[#allocation2 + $0x4b0] ss:$12 sps:$4 sm:$0xff]  }
  0x3c   :  { %4101 = vmatprep.subr.bf16.mxu1 %v5980_v33  ;;  %v6064_v32 = vld [vmem:[#allocation2 + $0x31c] ss:$12 sps:$4 sm:$0xff]   ;;  %v6082_v50 = vld [vmem:[#allocation2 + $0x454] ss:$12 sps:$4 sm:$0xff]  }
  0x3d   :  { %v6067_v33 = vld [vmem:[#allocation2 + $0x49c] ss:$12 sps:$4 sm:$0xff]   ;;  %v6085_v51 = vld [vmem:[#allocation2 + $0x5d4] ss:$12 sps:$4 sm:$0xff]  }
  0x3e   :  { %4059 = vmatpush2.bf16.msra.mxu0 %v5982_v34  ;;  %v6062_v34 = vld [vmem:[#allocation2 + $0x318] ss:$12 sps:$4 sm:$0xff]   ;;  %v6074_v48 = vld [vmem:[#allocation2 + $0x468] ss:$12 sps:$4 sm:$0xff]  }
  0x3f   :  { %4102 = vmatpush2.bf16.msra.mxu1 %v5983_v35  ;;  %4060 = vmatprep.subr.bf16.mxu0 %v5984_v36  ;;  %v6065_v35 = vld [vmem:[#allocation2 + $0x498] ss:$12 sps:$4 sm:$0xff]   ;;  %v6799_v36 = vld [vmem:[%s7129_s0 + $0x10] sm:$0xff] }
  0x40   :  { %4103 = vmatprep.subr.bf16.mxu1 %v5986_v37  ;;  %v6804_v37 = vld [vmem:[%s7129_s0 + $0x70] sm:$0xff] }
  0x41   :  { %v6077_v49 = vld [vmem:[#allocation2 + $0x5e8] ss:$12 sps:$4 sm:$0xff]  }
  0x42   :  { %4061 = vmatpush2.bf16.msra.mxu0 %v5988_v38  ;;  %v6809_v38 = vld [vmem:[%s7129_s0 + $0x18] sm:$0xff] }
  0x43   :  { %4104 = vmatpush2.bf16.msra.mxu1 %v5989_v39  ;;  %4062 = vmatprep.subr.bf16.mxu0 %v5990_v40  ;;  %v6814_v39 = vld [vmem:[%s7129_s0 + $0x78] sm:$0xff]  ;;  %v6070_v40 = vld [vmem:[#allocation2 + $0x304] ss:$12 sps:$4 sm:$0xff]  }
  0x44   :  { %4105 = vmatprep.subr.bf16.mxu1 %v5992_v41  ;;  %v6818_v41 = vcombine.high %v6799_v36, %v6804_v37 }
  0x46   :  { %4063 = vmatpush2.bf16.msra.mxu0 %v5994_v42  ;;  %v6073_v42 = vld [vmem:[#allocation2 + $0x484] ss:$12 sps:$4 sm:$0xff]  }
  0x47   :  { %4106 = vmatpush2.bf16.msra.mxu1 %v5995_v43  ;;  %4064 = vmatprep.subr.bf16.mxu0 %v5996_v44  ;;  %v6822_v43 = vcombine.high %v6809_v38, %v6814_v39  ;;  %v6068_v44 = vld [vmem:[#allocation2 + $0x300] ss:$12 sps:$4 sm:$0xff]  }
  0x48   :  { %4107 = vmatprep.subr.bf16.mxu1 %v5998_v45  ;;  %v6071_v45 = vld [vmem:[#allocation2 + $0x480] ss:$12 sps:$4 sm:$0xff]  }
  0x4a   :  { %4065 = vmatpush2.bf16.msra.mxu0 %v6000_v46  ;;  %v6076_v46 = vld [vmem:[#allocation2 + $0x46c] ss:$12 sps:$4 sm:$0xff]  }
  0x4b   :  { %4108 = vmatpush2.bf16.msra.mxu1 %v6001_v47  ;;  %4066 = vmatprep.subr.bf16.mxu0 %v6002_v52  ;;  %v6079_v47 = vld [vmem:[#allocation2 + $0x5ec] ss:$12 sps:$4 sm:$0xff]   ;;  %v6080_v52 = vld [vmem:[#allocation2 + $0x450] ss:$12 sps:$4 sm:$0xff]  }
  0x4c   :  { %4109 = vmatprep.subr.bf16.mxu1 %v6004_v54  ;;  %v6083_v54 = vld [vmem:[#allocation2 + $0x5d0] ss:$12 sps:$4 sm:$0xff]  }
  0x4e   :  { %4067 = vmatpush2.bf16.msra.mxu0 %v6006_v56  ;;  %v6088_v56 = vld [vmem:[#allocation2 + $0x43c] ss:$12 sps:$4 sm:$0xff]  }
  0x4f   :  { %4110 = vmatpush2.bf16.msra.mxu1 %v6007_v57  ;;  %4068 = vmatprep.subr.bf16.mxu0 %v6008_v58  ;;  %v6091_v57 = vld [vmem:[#allocation2 + $0x5bc] ss:$12 sps:$4 sm:$0xff]   ;;  %v6086_v58 = vld [vmem:[#allocation2 + $0x438] ss:$12 sps:$4 sm:$0xff]  }
  0x50   :  { %4111 = vmatprep.subr.bf16.mxu1 %v6010_v59  ;;  %v6089_v59 = vld [vmem:[#allocation2 + $0x5b8] ss:$12 sps:$4 sm:$0xff]  }
  0x52   :  { %4069 = vmatpush2.bf16.msra.mxu0 %v6012_v60  ;;  %v6094_v60 = vld [vmem:[#allocation2 + $0x424] ss:$12 sps:$4 sm:$0xff]  }
  0x53   :  { %4112 = vmatpush2.bf16.msra.mxu1 %v6013_v61  ;;  %4070 = vmatprep.subr.bf16.mxu0 %v6014_v62  ;;  %v6097_v61 = vld [vmem:[#allocation2 + $0x5a4] ss:$12 sps:$4 sm:$0xff]   ;;  %v6092_v62 = vld [vmem:[#allocation2 + $0x420] ss:$12 sps:$4 sm:$0xff]  }
  0x54   :  { %4113 = vmatprep.subr.bf16.mxu1 %v6016_v63  ;;  %v6095_v63 = vld [vmem:[#allocation2 + $0x5a0] ss:$12 sps:$4 sm:$0xff]  }
  0x56   :  { %4071 = vmatpush2.bf16.msra.mxu0 %v6018_v0  ;;  %v6100_v0 = vld [vmem:[#allocation2 + $0x40c] ss:$12 sps:$4 sm:$0xff]  }
  0x57   :  { %4114 = vmatpush2.bf16.msra.mxu1 %v6019_v1  ;;  %4072 = vmatprep.subr.bf16.mxu0 %v6020_v2  ;;  %v6103_v1 = vld [vmem:[#allocation2 + $0x58c] ss:$12 sps:$4 sm:$0xff]   ;;  %v6098_v2 = vld [vmem:[#allocation2 + $0x408] ss:$12 sps:$4 sm:$0xff]  }
  0x58   :  { %4115 = vmatprep.subr.bf16.mxu1 %v6022_v3  ;;  %v6101_v3 = vld [vmem:[#allocation2 + $0x588] ss:$12 sps:$4 sm:$0xff]  }
  0x5a   :  { %4073 = vmatpush2.bf16.msra.mxu0 %v6024_v4  ;;  %v6106_v4 = vld [vmem:[#allocation2 + $0x3f4] ss:$12 sps:$4 sm:$0xff]  }
  0x5b   :  { %4116 = vmatpush2.bf16.msra.mxu1 %v6025_v5  ;;  %4128 = vmatprep.subr.bf16.mxu0 %v6028_v6  ;;  %v6109_v5 = vld [vmem:[#allocation2 + $0x574] ss:$12 sps:$4 sm:$0xff]   ;;  %v6104_v6 = vld [vmem:[#allocation2 + $0x3f0] ss:$12 sps:$4 sm:$0xff]  }
  0x5c   :  { %4171 = vmatprep.subr.bf16.mxu1 %v6031_v7  ;;  %v6107_v7 = vld [vmem:[#allocation2 + $0x570] ss:$12 sps:$4 sm:$0xff]  }
  0x5d   :  { %4075 = vmatmul.mubr.bf16.vlgmr.msra.gmra.mxu0 %v6790_v8 }
  0x5e   :  { %4118 = vmatmul.mubr.bf16.vlgmr.msra.gmra.mxu1 %v6792_v9  ;;  %4129 = vmatpush1.bf16.msra.mxu0 %v6026_v10  ;;  %v6112_v10 = vld [vmem:[#allocation2 + $0x3dc] ss:$12 sps:$4 sm:$0xff]  }
  0x5f   :  { %4172 = vmatpush1.bf16.msra.mxu1 %v6029_v11  ;;  %4130 = vmatprep.subr.bf16.mxu0 %v6034_v12  ;;  %v6115_v11 = vld [vmem:[#allocation2 + $0x55c] ss:$12 sps:$4 sm:$0xff]   ;;  %v6110_v12 = vld [vmem:[#allocation2 + $0x3d8] ss:$12 sps:$4 sm:$0xff]  }
  0x60   :  { %4173 = vmatprep.subr.bf16.mxu1 %v6037_v13  ;;  %4160 = vmatprep.mubr.bf16.mxu0 %v6818_v41  ;;  %v6113_v13 = vld [vmem:[#allocation2 + $0x558] ss:$12 sps:$4 sm:$0xff]  }
  0x61   :  { %4203 = vmatprep.mubr.bf16.mxu1 %v6822_v43 }
  0x62   :  { %4131 = vmatpush1.bf16.msra.mxu0 %v6032_v14  ;;  %v6118_v14 = vld [vmem:[#allocation2 + $0x3c4] ss:$12 sps:$4 sm:$0xff]  }
  0x63   :  { %4174 = vmatpush1.bf16.msra.mxu1 %v6035_v15  ;;  %4132 = vmatprep.subr.bf16.mxu0 %v6040_v16  ;;  %v6121_v15 = vld [vmem:[#allocation2 + $0x544] ss:$12 sps:$4 sm:$0xff]   ;;  %v6116_v16 = vld [vmem:[#allocation2 + $0x3c0] ss:$12 sps:$4 sm:$0xff]  }
  0x64   :  { %4175 = vmatprep.subr.bf16.mxu1 %v6043_v17  ;;  %v6119_v17 = vld [vmem:[#allocation2 + $0x540] ss:$12 sps:$4 sm:$0xff]  }
  0x66   :  { %4133 = vmatpush1.bf16.msra.mxu0 %v6038_v18  ;;  %v6124_v18 = vld [vmem:[#allocation2 + $0x6ac] ss:$12 sps:$4 sm:$0xff]  }
  0x67   :  { %4176 = vmatpush1.bf16.msra.mxu1 %v6041_v19  ;;  %4134 = vmatprep.subr.bf16.mxu0 %v6046_v20  ;;  %v6127_v19 = vld [vmem:[#allocation2 + $0x82c] ss:$12 sps:$4 sm:$0xff]   ;;  %v6828_v20 = vcombine.low %v6799_v36, %v6804_v37 }
  0x68   :  { %4177 = vmatprep.subr.bf16.mxu1 %v6049_v21  ;;  %v6832_v21 = vcombine.low %v6809_v38, %v6814_v39  ;;  %v6134_v36 = vld [vmem:[#allocation2 + $0x678] ss:$12 sps:$4 sm:$0xff]  }
  0x69   :  { %v6137_v37 = vld [vmem:[#allocation2 + $0x7f8] ss:$12 sps:$4 sm:$0xff]  }
  0x6a   :  { %4135 = vmatpush1.bf16.msra.mxu0 %v6044_v22  ;;  %v6122_v22 = vld [vmem:[#allocation2 + $0x6a8] ss:$12 sps:$4 sm:$0xff]   ;;  %v6142_v38 = vld [vmem:[#allocation2 + $0x664] ss:$12 sps:$4 sm:$0xff]  }
  0x6b   :  { %4178 = vmatpush1.bf16.msra.mxu1 %v6047_v23  ;;  %4136 = vmatprep.subr.bf16.mxu0 %v6052_v24  ;;  %v6125_v23 = vld [vmem:[#allocation2 + $0x828] ss:$12 sps:$4 sm:$0xff]   ;;  %v6145_v39 = vld [vmem:[#allocation2 + $0x7e4] ss:$12 sps:$4 sm:$0xff]  }
  0x6c   :  { %4179 = vmatprep.subr.bf16.mxu1 %v6055_v25  ;;  %v6130_v24 = vld [vmem:[#allocation2 + $0x694] ss:$12 sps:$4 sm:$0xff]  }
  0x6d   :  { %v6133_v25 = vld [vmem:[#allocation2 + $0x814] ss:$12 sps:$4 sm:$0xff]  }
  0x6e   :  { %4137 = vmatpush1.bf16.msra.mxu0 %v6050_v26  ;;  %v6128_v26 = vld [vmem:[#allocation2 + $0x690] ss:$12 sps:$4 sm:$0xff]  }
  0x6f   :  { %4180 = vmatpush1.bf16.msra.mxu1 %v6053_v27  ;;  %4138 = vmatprep.subr.bf16.mxu0 %v6058_v28  ;;  %v6131_v27 = vld [vmem:[#allocation2 + $0x810] ss:$12 sps:$4 sm:$0xff]   ;;  %v6837_v28 = vld [vmem:[%s7129_s0 + $0x20] sm:$0xff] }
  0x70   :  { %4181 = vmatprep.subr.bf16.mxu1 %v6061_v29  ;;  %v6844_v29 = vld [vmem:[%s7129_s0 + $0x80] sm:$0xff] }
  0x72   :  { %4139 = vmatpush1.bf16.msra.mxu0 %v6056_v30  ;;  %v6849_v30 = vld [vmem:[%s7129_s0 + $0x28] sm:$0xff] }
  0x73   :  { %4182 = vmatpush1.bf16.msra.mxu1 %v6059_v31  ;;  %4140 = vmatprep.subr.bf16.mxu0 %v6064_v32  ;;  %v6854_v31 = vld [vmem:[%s7129_s0 + $0x88] sm:$0xff] }
  0x74   :  { %4183 = vmatprep.subr.bf16.mxu1 %v6067_v33  ;;  %v6136_v32 = vld [vmem:[#allocation2 + $0x67c] ss:$12 sps:$4 sm:$0xff]   ;;  %v6858_v33 = vcombine.high %v6837_v28, %v6844_v29 }
  0x76   :  { %4141 = vmatpush1.bf16.msra.mxu0 %v6062_v34  ;;  %v6139_v34 = vld [vmem:[#allocation2 + $0x7fc] ss:$12 sps:$4 sm:$0xff]  }
  0x77   :  { %4184 = vmatpush1.bf16.msra.mxu1 %v6065_v35  ;;  %4142 = vmatprep.subr.bf16.mxu0 %v6070_v40  ;;  %v6862_v35 = vcombine.high %v6849_v30, %v6854_v31  ;;  %v6140_v40 = vld [vmem:[#allocation2 + $0x660] ss:$12 sps:$4 sm:$0xff]  }
  0x78   :  { %4185 = vmatprep.subr.bf16.mxu1 %v6073_v42  ;;  %v6143_v42 = vld [vmem:[#allocation2 + $0x7e0] ss:$12 sps:$4 sm:$0xff]  }
  0x7a   :  { %4143 = vmatpush1.bf16.msra.mxu0 %v6068_v44  ;;  %v6148_v44 = vld [vmem:[#allocation2 + $0x64c] ss:$12 sps:$4 sm:$0xff]  }
  0x7b   :  { %4186 = vmatpush1.bf16.msra.mxu1 %v6071_v45  ;;  %4144 = vmatprep.subr.bf16.mxu0 %v6076_v46  ;;  %v6151_v45 = vld [vmem:[#allocation2 + $0x7cc] ss:$12 sps:$4 sm:$0xff]   ;;  %v6146_v46 = vld [vmem:[#allocation2 + $0x648] ss:$12 sps:$4 sm:$0xff]  }
  0x7c   :  { %4187 = vmatprep.subr.bf16.mxu1 %v6079_v47  ;;  %v6149_v47 = vld [vmem:[#allocation2 + $0x7c8] ss:$12 sps:$4 sm:$0xff]  }
  0x7e   :  { %4145 = vmatpush2.bf16.msra.mxu0 %v6074_v48  ;;  %v6154_v48 = vld [vmem:[#allocation2 + $0x634] ss:$12 sps:$4 sm:$0xff]  }
  0x7f   :  { %4188 = vmatpush2.bf16.msra.mxu1 %v6077_v49  ;;  %4146 = vmatprep.subr.bf16.mxu0 %v6082_v50  ;;  %v6157_v49 = vld [vmem:[#allocation2 + $0x7b4] ss:$12 sps:$4 sm:$0xff]   ;;  %v6152_v50 = vld [vmem:[#allocation2 + $0x630] ss:$12 sps:$4 sm:$0xff]  }
  0x80   :  { %4189 = vmatprep.subr.bf16.mxu1 %v6085_v51  ;;  %v6155_v51 = vld [vmem:[#allocation2 + $0x7b0] ss:$12 sps:$4 sm:$0xff]  }
  0x82   :  { %4147 = vmatpush2.bf16.msra.mxu0 %v6080_v52  ;;  %v6160_v52 = vld [vmem:[#allocation2 + $0x61c] ss:$12 sps:$4 sm:$0xff]  }
  0x83   :  { %4190 = vmatpush2.bf16.msra.mxu1 %v6083_v54  ;;  %4148 = vmatprep.subr.bf16.mxu0 %v6088_v56  ;;  %v6163_v54 = vld [vmem:[#allocation2 + $0x79c] ss:$12 sps:$4 sm:$0xff]   ;;  %v6158_v56 = vld [vmem:[#allocation2 + $0x618] ss:$12 sps:$4 sm:$0xff]  }
  0x84   :  { %4191 = vmatprep.subr.bf16.mxu1 %v6091_v57  ;;  %v6161_v57 = vld [vmem:[#allocation2 + $0x798] ss:$12 sps:$4 sm:$0xff]  }
  0x86   :  { %4149 = vmatpush2.bf16.msra.mxu0 %v6086_v58  ;;  %v6166_v58 = vld [vmem:[#allocation2 + $0x604] ss:$12 sps:$4 sm:$0xff]  }
  0x87   :  { %4192 = vmatpush2.bf16.msra.mxu1 %v6089_v59  ;;  %4150 = vmatprep.subr.bf16.mxu0 %v6094_v60  ;;  %v6169_v59 = vld [vmem:[#allocation2 + $0x784] ss:$12 sps:$4 sm:$0xff]   ;;  %v6164_v60 = vld [vmem:[#allocation2 + $0x600] ss:$12 sps:$4 sm:$0xff]  }
  0x88   :  { %4193 = vmatprep.subr.bf16.mxu1 %v6097_v61  ;;  %v6167_v61 = vld [vmem:[#allocation2 + $0x780] ss:$12 sps:$4 sm:$0xff]  }
  0x8a   :  { %4151 = vmatpush2.bf16.msra.mxu0 %v6092_v62  ;;  %v6172_v62 = vld [vmem:[#allocation2 + $0x76c] ss:$12 sps:$4 sm:$0xff]  }
  0x8b   :  { %4194 = vmatpush2.bf16.msra.mxu1 %v6095_v63  ;;  %4152 = vmatprep.subr.bf16.mxu0 %v6100_v0  ;;  %v6175_v63 = vld [vmem:[#allocation2 + $0x8ec] ss:$12 sps:$4 sm:$0xff]   ;;  %v6170_v0 = vld [vmem:[#allocation2 + $0x768] ss:$12 sps:$4 sm:$0xff]  }
  0x8c   :  { %4195 = vmatprep.subr.bf16.mxu1 %v6103_v1  ;;  %v6173_v1 = vld [vmem:[#allocation2 + $0x8e8] ss:$12 sps:$4 sm:$0xff]  }
  0x8e   :  { %4153 = vmatpush2.bf16.msra.mxu0 %v6098_v2  ;;  %v6178_v2 = vld [vmem:[#allocation2 + $0x754] ss:$12 sps:$4 sm:$0xff]  }
  0x8f   :  { %4196 = vmatpush2.bf16.msra.mxu1 %v6101_v3  ;;  %4154 = vmatprep.subr.bf16.mxu0 %v6106_v4  ;;  %v6181_v3 = vld [vmem:[#allocation2 + $0x8d4] ss:$12 sps:$4 sm:$0xff]   ;;  %v6176_v4 = vld [vmem:[#allocation2 + $0x750] ss:$12 sps:$4 sm:$0xff]  }
  0x90   :  { %4197 = vmatprep.subr.bf16.mxu1 %v6109_v5  ;;  %v6179_v5 = vld [vmem:[#allocation2 + $0x8d0] ss:$12 sps:$4 sm:$0xff]  }
  0x92   :  { %4155 = vmatpush2.bf16.msra.mxu0 %v6104_v6  ;;  %v6184_v6 = vld [vmem:[#allocation2 + $0x73c] ss:$12 sps:$4 sm:$0xff]  }
  0x93   :  { %4198 = vmatpush2.bf16.msra.mxu1 %v6107_v7  ;;  %4156 = vmatprep.subr.bf16.mxu0 %v6112_v10  ;;  %v6187_v7 = vld [vmem:[#allocation2 + $0x8bc] ss:$12 sps:$4 sm:$0xff]   ;;  %v6182_v10 = vld [vmem:[#allocation2 + $0x738] ss:$12 sps:$4 sm:$0xff]  }
  0x94   :  { %4199 = vmatprep.subr.bf16.mxu1 %v6115_v11  ;;  %v6185_v11 = vld [vmem:[#allocation2 + $0x8b8] ss:$12 sps:$4 sm:$0xff]  }
  0x96   :  { %4157 = vmatpush2.bf16.msra.mxu0 %v6110_v12  ;;  %v6190_v12 = vld [vmem:[#allocation2 + $0x724] ss:$12 sps:$4 sm:$0xff]  }
  0x97   :  { %4200 = vmatpush2.bf16.msra.mxu1 %v6113_v13  ;;  %4158 = vmatprep.subr.bf16.mxu0 %v6118_v14  ;;  %v6193_v13 = vld [vmem:[#allocation2 + $0x8a4] ss:$12 sps:$4 sm:$0xff]   ;;  %v6188_v14 = vld [vmem:[#allocation2 + $0x720] ss:$12 sps:$4 sm:$0xff]  }
  0x98   :  { %4201 = vmatprep.subr.bf16.mxu1 %v6121_v15  ;;  %v6191_v15 = vld [vmem:[#allocation2 + $0x8a0] ss:$12 sps:$4 sm:$0xff]  }
  0x9a   :  { %4159 = vmatpush2.bf16.msra.mxu0 %v6116_v16  ;;  %v6196_v16 = vld [vmem:[#allocation2 + $0x70c] ss:$12 sps:$4 sm:$0xff]  }
  0x9b   :  { %4202 = vmatpush2.bf16.msra.mxu1 %v6119_v17  ;;  %4214 = vmatprep.subr.bf16.mxu0 %v6124_v18  ;;  %v6199_v17 = vld [vmem:[#allocation2 + $0x88c] ss:$12 sps:$4 sm:$0xff]   ;;  %v6194_v18 = vld [vmem:[#allocation2 + $0x708] ss:$12 sps:$4 sm:$0xff]  }
  0x9c   :  { %4257 = vmatprep.subr.bf16.mxu1 %v6127_v19  ;;  %v6197_v19 = vld [vmem:[#allocation2 + $0x888] ss:$12 sps:$4 sm:$0xff]  }
  0x9d   :  { %4161 = vmatmul.mubr.bf16.vlgmr.msra.gmra.mxu0 %v6828_v20 }
  0x9e   :  { %4204 = vmatmul.mubr.bf16.vlgmr.msra.gmra.mxu1 %v6832_v21  ;;  %4215 = vmatpush1.bf16.msra.mxu0 %v6122_v22  ;;  %v6202_v22 = vld [vmem:[#allocation2 + $0x6f4] ss:$12 sps:$4 sm:$0xff]  }
  0x9f   :  { %4258 = vmatpush1.bf16.msra.mxu1 %v6125_v23  ;;  %4216 = vmatprep.subr.bf16.mxu0 %v6130_v24  ;;  %v6205_v23 = vld [vmem:[#allocation2 + $0x874] ss:$12 sps:$4 sm:$0xff]   ;;  %v6200_v24 = vld [vmem:[#allocation2 + $0x6f0] ss:$12 sps:$4 sm:$0xff]  }
  0xa0   :  { %4259 = vmatprep.subr.bf16.mxu1 %v6133_v25  ;;  %4246 = vmatprep.mubr.bf16.mxu0 %v6858_v33  ;;  %v6203_v25 = vld [vmem:[#allocation2 + $0x870] ss:$12 sps:$4 sm:$0xff]  }
  0xa1   :  { %4289 = vmatprep.mubr.bf16.mxu1 %v6862_v35 }
  0xa2   :  { %4217 = vmatpush1.bf16.msra.mxu0 %v6128_v26  ;;  %v6208_v26 = vld [vmem:[#allocation2 + $0x6dc] ss:$12 sps:$4 sm:$0xff]  }
  0xa3   :  { %4260 = vmatpush1.bf16.msra.mxu1 %v6131_v27  ;;  %4218 = vmatprep.subr.bf16.mxu0 %v6136_v32  ;;  %v6211_v27 = vld [vmem:[#allocation2 + $0x85c] ss:$12 sps:$4 sm:$0xff]   ;;  %v6206_v32 = vld [vmem:[#allocation2 + $0x6d8] ss:$12 sps:$4 sm:$0xff]  }
  0xa4   :  { %4261 = vmatprep.subr.bf16.mxu1 %v6139_v34  ;;  %v6209_v34 = vld [vmem:[#allocation2 + $0x858] ss:$12 sps:$4 sm:$0xff]  }
  0xa6   :  { %4219 = vmatpush1.bf16.msra.mxu0 %v6134_v36  ;;  %v6214_v36 = vld [vmem:[#allocation2 + $0x6c4] ss:$12 sps:$4 sm:$0xff]  }
  0xa7   :  { %4262 = vmatpush1.bf16.msra.mxu1 %v6137_v37  ;;  %4220 = vmatprep.subr.bf16.mxu0 %v6142_v38  ;;  %v6217_v37 = vld [vmem:[#allocation2 + $0x844] ss:$12 sps:$4 sm:$0xff]   ;;  %v6212_v38 = vld [vmem:[#allocation2 + $0x6c0] ss:$12 sps:$4 sm:$0xff]  }
  0xa8   :  { %4263 = vmatprep.subr.bf16.mxu1 %v6145_v39  ;;  %v6215_v39 = vld [vmem:[#allocation2 + $0x840] ss:$12 sps:$4 sm:$0xff]  }
  0xaa   :  { %4221 = vmatpush1.bf16.msra.mxu0 %v6140_v40  ;;  %v6220_v40 = vld [vmem:[#allocation2 + $0x9ac] ss:$12 sps:$4 sm:$0xff]  }
  0xab   :  { %4264 = vmatpush1.bf16.msra.mxu1 %v6143_v42  ;;  %4222 = vmatprep.subr.bf16.mxu0 %v6148_v44  ;;  %v6223_v42 = vld [vmem:[#allocation2 + $0xb2c] ss:$12 sps:$4 sm:$0xff]   ;;  %v6869_v44 = vld [vmem:[%s7129_s0 + $0x30] sm:$0xff] }
  0xac   :  { %4265 = vmatprep.subr.bf16.mxu1 %v6151_v45  ;;  %v6218_v45 = vld [vmem:[#allocation2 + $0x9a8] ss:$12 sps:$4 sm:$0xff]  }
  0xae   :  { %4223 = vmatpush1.bf16.msra.mxu0 %v6146_v46  ;;  %v6874_v46 = vld [vmem:[%s7129_s0 + $0x90] sm:$0xff] }
  0xaf   :  { %4266 = vmatpush1.bf16.msra.mxu1 %v6149_v47  ;;  %4224 = vmatprep.subr.bf16.mxu0 %v6154_v48  ;;  %v6879_v47 = vld [vmem:[%s7129_s0 + $0x38] sm:$0xff]  ;;  %v6883_v48 = vcombine.low %v6837_v28, %v6844_v29  ;;  %v6896_v28 = vcombine.high %v6869_v44, %v6874_v46 }
  0xb0   :  { %4267 = vmatprep.subr.bf16.mxu1 %v6157_v49  ;;  %v6887_v49 = vcombine.low %v6849_v30, %v6854_v31  ;;  %v6224_v30 = vld [vmem:[#allocation2 + $0x990] ss:$12 sps:$4 sm:$0xff]  }
  0xb1   :  { %v6227_v31 = vld [vmem:[#allocation2 + $0xb10] ss:$12 sps:$4 sm:$0xff]  }
  0xb2   :  { %4225 = vmatpush1.bf16.msra.mxu0 %v6152_v50  ;;  %v6892_v50 = vld [vmem:[%s7129_s0 + $0x98] sm:$0xff] }
  0xb3   :  { %4268 = vmatpush1.bf16.msra.mxu1 %v6155_v51  ;;  %4226 = vmatprep.subr.bf16.mxu0 %v6160_v52  ;;  %v6221_v51 = vld [vmem:[#allocation2 + $0xb28] ss:$12 sps:$4 sm:$0xff]   ;;  %v6900_v29 = vcombine.high %v6879_v47, %v6892_v50 }
  0xb4   :  { %4269 = vmatprep.subr.bf16.mxu1 %v6163_v54  ;;  %v6226_v52 = vld [vmem:[#allocation2 + $0x994] ss:$12 sps:$4 sm:$0xff]  }
  0xb5   :  { %v6229_v54 = vld [vmem:[#allocation2 + $0xb14] ss:$12 sps:$4 sm:$0xff]  }
  0xb6   :  { %4227 = vmatpush1.bf16.msra.mxu0 %v6158_v56  ;;  %v6232_v56 = vld [vmem:[#allocation2 + $0x97c] ss:$12 sps:$4 sm:$0xff]  }
  0xb7   :  { %4270 = vmatpush1.bf16.msra.mxu1 %v6161_v57  ;;  %4228 = vmatprep.subr.bf16.mxu0 %v6166_v58  ;;  %v6235_v57 = vld [vmem:[#allocation2 + $0xafc] ss:$12 sps:$4 sm:$0xff]   ;;  %v6230_v58 = vld [vmem:[#allocation2 + $0x978] ss:$12 sps:$4 sm:$0xff]  }
  0xb8   :  { %4271 = vmatprep.subr.bf16.mxu1 %v6169_v59  ;;  %v6233_v59 = vld [vmem:[#allocation2 + $0xaf8] ss:$12 sps:$4 sm:$0xff]  }
  0xba   :  { %4229 = vmatpush1.bf16.msra.mxu0 %v6164_v60  ;;  %v6238_v60 = vld [vmem:[#allocation2 + $0x964] ss:$12 sps:$4 sm:$0xff]  }
  0xbb   :  { %4272 = vmatpush1.bf16.msra.mxu1 %v6167_v61  ;;  %4230 = vmatprep.subr.bf16.mxu0 %v6172_v62  ;;  %v6241_v61 = vld [vmem:[#allocation2 + $0xae4] ss:$12 sps:$4 sm:$0xff]   ;;  %v6236_v62 = vld [vmem:[#allocation2 + $0x960] ss:$12 sps:$4 sm:$0xff]  }
  0xbc   :  { %4273 = vmatprep.subr.bf16.mxu1 %v6175_v63  ;;  %v6239_v63 = vld [vmem:[#allocation2 + $0xae0] ss:$12 sps:$4 sm:$0xff]  }
  0xbe   :  { %4231 = vmatpush2.bf16.msra.mxu0 %v6170_v0  ;;  %v6244_v0 = vld [vmem:[#allocation2 + $0x94c] ss:$12 sps:$4 sm:$0xff]  }
  0xbf   :  { %4274 = vmatpush2.bf16.msra.mxu1 %v6173_v1  ;;  %4232 = vmatprep.subr.bf16.mxu0 %v6178_v2  ;;  %v6247_v1 = vld [vmem:[#allocation2 + $0xacc] ss:$12 sps:$4 sm:$0xff]   ;;  %v6242_v2 = vld [vmem:[#allocation2 + $0x948] ss:$12 sps:$4 sm:$0xff]  }
  0xc0   :  { %4275 = vmatprep.subr.bf16.mxu1 %v6181_v3  ;;  %v6245_v3 = vld [vmem:[#allocation2 + $0xac8] ss:$12 sps:$4 sm:$0xff]  }
  0xc2   :  { %4233 = vmatpush2.bf16.msra.mxu0 %v6176_v4  ;;  %v6250_v4 = vld [vmem:[#allocation2 + $0x934] ss:$12 sps:$4 sm:$0xff]  }
  0xc3   :  { %4276 = vmatpush2.bf16.msra.mxu1 %v6179_v5  ;;  %4234 = vmatprep.subr.bf16.mxu0 %v6184_v6  ;;  %v6253_v5 = vld [vmem:[#allocation2 + $0xab4] ss:$12 sps:$4 sm:$0xff]   ;;  %v6248_v6 = vld [vmem:[#allocation2 + $0x930] ss:$12 sps:$4 sm:$0xff]  }
  0xc4   :  { %4277 = vmatprep.subr.bf16.mxu1 %v6187_v7  ;;  %v6251_v7 = vld [vmem:[#allocation2 + $0xab0] ss:$12 sps:$4 sm:$0xff]  }
  0xc6   :  { %4235 = vmatpush2.bf16.msra.mxu0 %v6182_v10  ;;  %v6256_v10 = vld [vmem:[#allocation2 + $0x91c] ss:$12 sps:$4 sm:$0xff]  }
  0xc7   :  { %4278 = vmatpush2.bf16.msra.mxu1 %v6185_v11  ;;  %4236 = vmatprep.subr.bf16.mxu0 %v6190_v12  ;;  %v6259_v11 = vld [vmem:[#allocation2 + $0xa9c] ss:$12 sps:$4 sm:$0xff]   ;;  %v6254_v12 = vld [vmem:[#allocation2 + $0x918] ss:$12 sps:$4 sm:$0xff]  }
  0xc8   :  { %4279 = vmatprep.subr.bf16.mxu1 %v6193_v13  ;;  %v6257_v13 = vld [vmem:[#allocation2 + $0xa98] ss:$12 sps:$4 sm:$0xff]  }
  0xca   :  { %4237 = vmatpush2.bf16.msra.mxu0 %v6188_v14  ;;  %v6262_v14 = vld [vmem:[#allocation2 + $0x904] ss:$12 sps:$4 sm:$0xff]  }
  0xcb   :  { %4280 = vmatpush2.bf16.msra.mxu1 %v6191_v15  ;;  %4238 = vmatprep.subr.bf16.mxu0 %v6196_v16  ;;  %v6265_v15 = vld [vmem:[#allocation2 + $0xa84] ss:$12 sps:$4 sm:$0xff]   ;;  %v6260_v16 = vld [vmem:[#allocation2 + $0x900] ss:$12 sps:$4 sm:$0xff]  }
  0xcc   :  { %4281 = vmatprep.subr.bf16.mxu1 %v6199_v17  ;;  %v6263_v17 = vld [vmem:[#allocation2 + $0xa80] ss:$12 sps:$4 sm:$0xff]  }
  0xce   :  { %4239 = vmatpush2.bf16.msra.mxu0 %v6194_v18  ;;  %v6268_v18 = vld [vmem:[#allocation2 + $0xa6c] ss:$12 sps:$4 sm:$0xff]  }
  0xcf   :  { %4282 = vmatpush2.bf16.msra.mxu1 %v6197_v19  ;;  %4240 = vmatprep.subr.bf16.mxu0 %v6202_v22  ;;  %v6271_v19 = vld [vmem:[#allocation2 + $0xbec] ss:$12 sps:$4 sm:$0xff]   ;;  %v6266_v22 = vld [vmem:[#allocation2 + $0xa68] ss:$12 sps:$4 sm:$0xff]  }
  0xd0   :  { %4283 = vmatprep.subr.bf16.mxu1 %v6205_v23  ;;  %v6269_v23 = vld [vmem:[#allocation2 + $0xbe8] ss:$12 sps:$4 sm:$0xff]  }
  0xd2   :  { %4241 = vmatpush2.bf16.msra.mxu0 %v6200_v24  ;;  %v6274_v24 = vld [vmem:[#allocation2 + $0xa54] ss:$12 sps:$4 sm:$0xff]  }
  0xd3   :  { %4284 = vmatpush2.bf16.msra.mxu1 %v6203_v25  ;;  %4242 = vmatprep.subr.bf16.mxu0 %v6208_v26  ;;  %v6277_v25 = vld [vmem:[#allocation2 + $0xbd4] ss:$12 sps:$4 sm:$0xff]   ;;  %v6272_v26 = vld [vmem:[#allocation2 + $0xa50] ss:$12 sps:$4 sm:$0xff]  }
  0xd4   :  { %4285 = vmatprep.subr.bf16.mxu1 %v6211_v27  ;;  %v6275_v27 = vld [vmem:[#allocation2 + $0xbd0] ss:$12 sps:$4 sm:$0xff]  }
  0xd6   :  { %4243 = vmatpush2.bf16.msra.mxu0 %v6206_v32  ;;  %v6280_v32 = vld [vmem:[#allocation2 + $0xa3c] ss:$12 sps:$4 sm:$0xff]  }
  0xd7   :  { %4286 = vmatpush2.bf16.msra.mxu1 %v6209_v34  ;;  %4244 = vmatprep.subr.bf16.mxu0 %v6214_v36  ;;  %v6283_v34 = vld [vmem:[#allocation2 + $0xbbc] ss:$12 sps:$4 sm:$0xff]   ;;  %v6278_v36 = vld [vmem:[#allocation2 + $0xa38] ss:$12 sps:$4 sm:$0xff]  }
  0xd8   :  { %4287 = vmatprep.subr.bf16.mxu1 %v6217_v37  ;;  %v6281_v37 = vld [vmem:[#allocation2 + $0xbb8] ss:$12 sps:$4 sm:$0xff]  }
  0xda   :  { %4245 = vmatpush2.bf16.msra.mxu0 %v6212_v38  ;;  %v6286_v38 = vld [vmem:[#allocation2 + $0xa24] ss:$12 sps:$4 sm:$0xff]  }
  0xdb   :  { %4288 = vmatpush2.bf16.msra.mxu1 %v6215_v39  ;;  %4300 = vmatprep.subr.bf16.mxu0 %v6220_v40  ;;  %v6289_v39 = vld [vmem:[#allocation2 + $0xba4] ss:$12 sps:$4 sm:$0xff]   ;;  %v6284_v40 = vld [vmem:[#allocation2 + $0xa20] ss:$12 sps:$4 sm:$0xff]  }
  0xdc   :  { %4343 = vmatprep.subr.bf16.mxu1 %v6223_v42  ;;  %v6287_v42 = vld [vmem:[#allocation2 + $0xba0] ss:$12 sps:$4 sm:$0xff]  }
  0xdd   :  { %4247 = vmatmul.mubr.bf16.vlgmr.msra.gmra.mxu0 %v6883_v48 }
  0xde   :  { %4290 = vmatmul.mubr.bf16.vlgmr.msra.gmra.mxu1 %v6887_v49  ;;  %4301 = vmatpush1.bf16.msra.mxu0 %v6218_v45  ;;  %v6292_v45 = vld [vmem:[#allocation2 + $0xa0c] ss:$12 sps:$4 sm:$0xff]  }
  0xdf   :  { %4344 = vmatpush1.bf16.msra.mxu1 %v6221_v51  ;;  %4302 = vmatprep.subr.bf16.mxu0 %v6226_v52  ;;  %v6295_v51 = vld [vmem:[#allocation2 + $0xb8c] ss:$12 sps:$4 sm:$0xff]   ;;  %v6290_v52 = vld [vmem:[#allocation2 + $0xa08] ss:$12 sps:$4 sm:$0xff]  }
  0xe0   :  { %4345 = vmatprep.subr.bf16.mxu1 %v6229_v54  ;;  %4332 = vmatprep.mubr.bf16.mxu0 %v6896_v28  ;;  %v6293_v54 = vld [vmem:[#allocation2 + $0xb88] ss:$12 sps:$4 sm:$0xff]  }
  0xe1   :  { %4375 = vmatprep.mubr.bf16.mxu1 %v6900_v29 }
  0xe2   :  { %4303 = vmatpush1.bf16.msra.mxu0 %v6224_v30  ;;  %v6298_v30 = vld [vmem:[#allocation2 + $0x9f4] ss:$12 sps:$4 sm:$0xff]  }
  0xe3   :  { %4346 = vmatpush1.bf16.msra.mxu1 %v6227_v31  ;;  %4304 = vmatprep.subr.bf16.mxu0 %v6232_v56  ;;  %v6301_v31 = vld [vmem:[#allocation2 + $0xb74] ss:$12 sps:$4 sm:$0xff]   ;;  %v6296_v56 = vld [vmem:[#allocation2 + $0x9f0] ss:$12 sps:$4 sm:$0xff]  }
  0xe4   :  { %4347 = vmatprep.subr.bf16.mxu1 %v6235_v57  ;;  %v6299_v57 = vld [vmem:[#allocation2 + $0xb70] ss:$12 sps:$4 sm:$0xff]  }
  0xe6   :  { %4305 = vmatpush1.bf16.msra.mxu0 %v6230_v58  ;;  %v6304_v58 = vld [vmem:[#allocation2 + $0x9dc] ss:$12 sps:$4 sm:$0xff]  }
  0xe7   :  { %4348 = vmatpush1.bf16.msra.mxu1 %v6233_v59  ;;  %4306 = vmatprep.subr.bf16.mxu0 %v6238_v60  ;;  %v6307_v59 = vld [vmem:[#allocation2 + $0xb5c] ss:$12 sps:$4 sm:$0xff]   ;;  %v6302_v60 = vld [vmem:[#allocation2 + $0x9d8] ss:$12 sps:$4 sm:$0xff]  }
  0xe8   :  { %4349 = vmatprep.subr.bf16.mxu1 %v6241_v61  ;;  %v6305_v61 = vld [vmem:[#allocation2 + $0xb58] ss:$12 sps:$4 sm:$0xff]  }
  0xea   :  { %4307 = vmatpush1.bf16.msra.mxu0 %v6236_v62  ;;  %v6310_v62 = vld [vmem:[#allocation2 + $0x9c4] ss:$12 sps:$4 sm:$0xff]  }
  0xeb   :  { %4350 = vmatpush1.bf16.msra.mxu1 %v6239_v63  ;;  %4308 = vmatprep.subr.bf16.mxu0 %v6244_v0  ;;  %v6313_v63 = vld [vmem:[#allocation2 + $0xb44] ss:$12 sps:$4 sm:$0xff]   ;;  %v6308_v0 = vld [vmem:[#allocation2 + $0x9c0] ss:$12 sps:$4 sm:$0xff]  }
  0xec   :  { %4351 = vmatprep.subr.bf16.mxu1 %v6247_v1  ;;  %v6311_v1 = vld [vmem:[#allocation2 + $0xb40] ss:$12 sps:$4 sm:$0xff]  }
  0xee   :  { %4309 = vmatpush1.bf16.msra.mxu0 %v6242_v2  ;;  %v6316_v2 = vld [vmem:[#allocation2 + $0xcac] ss:$12 sps:$4 sm:$0xff]  }
  0xef   :  { %4352 = vmatpush1.bf16.msra.mxu1 %v6245_v3  ;;  %4310 = vmatprep.subr.bf16.mxu0 %v6250_v4  ;;  %v6319_v3 = vld [vmem:[#allocation2 + $0xe2c] ss:$12 sps:$4 sm:$0xff]   ;;  %v6909_v4 = vld [vmem:[%s7129_s0 + $0x40] sm:$0xff] }
  0xf0   :  { %4353 = vmatprep.subr.bf16.mxu1 %v6253_v5  ;;  %v6314_v5 = vld [vmem:[#allocation2 + $0xca8] ss:$12 sps:$4 sm:$0xff]  }
  0xf2   :  { %4311 = vmatpush1.bf16.msra.mxu0 %v6248_v6  ;;  %v6914_v6 = vld [vmem:[%s7129_s0 + $0xa0] sm:$0xff] }
  0xf3   :  { %4354 = vmatpush1.bf16.msra.mxu1 %v6251_v7  ;;  %4312 = vmatprep.subr.bf16.mxu0 %v6256_v10  ;;  %v6919_v7 = vld [vmem:[%s7129_s0 + $0x48] sm:$0xff]  ;;  %v6923_v10 = vcombine.low %v6869_v44, %v6874_v46  ;;  %v6936_v44 = vcombine.high %v6909_v4, %v6914_v6 }
  0xf4   :  { %4355 = vmatprep.subr.bf16.mxu1 %v6259_v11  ;;  %v6927_v11 = vcombine.low %v6879_v47, %v6892_v50  ;;  %v6320_v47 = vld [vmem:[#allocation2 + $0xc90] ss:$12 sps:$4 sm:$0xff]  }
  0xf5   :  { %v6323_v50 = vld [vmem:[#allocation2 + $0xe10] ss:$12 sps:$4 sm:$0xff]  }
  0xf6   :  { %4313 = vmatpush1.bf16.msra.mxu0 %v6254_v12  ;;  %v6932_v12 = vld [vmem:[%s7129_s0 + $0xa8] sm:$0xff] }
  0xf7   :  { %4356 = vmatpush1.bf16.msra.mxu1 %v6257_v13  ;;  %4314 = vmatprep.subr.bf16.mxu0 %v6262_v14  ;;  %v6317_v13 = vld [vmem:[#allocation2 + $0xe28] ss:$12 sps:$4 sm:$0xff]   ;;  %v6940_v46 = vcombine.high %v6919_v7, %v6932_v12 }
  0xf8   :  { %4357 = vmatprep.subr.bf16.mxu1 %v6265_v15  ;;  %v6322_v14 = vld [vmem:[#allocation2 + $0xc94] ss:$12 sps:$4 sm:$0xff]  }
  0xf9   :  { %v6325_v15 = vld [vmem:[#allocation2 + $0xe14] ss:$12 sps:$4 sm:$0xff]  }
  0xfa   :  { %4315 = vmatpush1.bf16.msra.mxu0 %v6260_v16  ;;  %v6328_v16 = vld [vmem:[#allocation2 + $0xc7c] ss:$12 sps:$4 sm:$0xff]  }
  0xfb   :  { %4358 = vmatpush1.bf16.msra.mxu1 %v6263_v17  ;;  %4316 = vmatprep.subr.bf16.mxu0 %v6268_v18  ;;  %v6331_v17 = vld [vmem:[#allocation2 + $0xdfc] ss:$12 sps:$4 sm:$0xff]   ;;  %v6326_v18 = vld [vmem:[#allocation2 + $0xc78] ss:$12 sps:$4 sm:$0xff]  }
  0xfc   :  { %4359 = vmatprep.subr.bf16.mxu1 %v6271_v19  ;;  %v6329_v19 = vld [vmem:[#allocation2 + $0xdf8] ss:$12 sps:$4 sm:$0xff]  }
  0xfe   :  { %4317 = vmatpush2.bf16.msra.mxu0 %v6266_v22  ;;  %v6334_v22 = vld [vmem:[#allocation2 + $0xc64] ss:$12 sps:$4 sm:$0xff]  }
  0xff   :  { %4360 = vmatpush2.bf16.msra.mxu1 %v6269_v23  ;;  %4318 = vmatprep.subr.bf16.mxu0 %v6274_v24  ;;  %v6337_v23 = vld [vmem:[#allocation2 + $0xde4] ss:$12 sps:$4 sm:$0xff]   ;;  %v6332_v24 = vld [vmem:[#allocation2 + $0xc60] ss:$12 sps:$4 sm:$0xff]  }
 0x100   :  { %4361 = vmatprep.subr.bf16.mxu1 %v6277_v25  ;;  %v6335_v25 = vld [vmem:[#allocation2 + $0xde0] ss:$12 sps:$4 sm:$0xff]  }
 0x102   :  { %4319 = vmatpush2.bf16.msra.mxu0 %v6272_v26  ;;  %v6340_v26 = vld [vmem:[#allocation2 + $0xc4c] ss:$12 sps:$4 sm:$0xff]  }
 0x103   :  { %4362 = vmatpush2.bf16.msra.mxu1 %v6275_v27  ;;  %4320 = vmatprep.subr.bf16.mxu0 %v6280_v32  ;;  %v6343_v27 = vld [vmem:[#allocation2 + $0xdcc] ss:$12 sps:$4 sm:$0xff]   ;;  %v6338_v32 = vld [vmem:[#allocation2 + $0xc48] ss:$12 sps:$4 sm:$0xff]  }
 0x104   :  { %4363 = vmatprep.subr.bf16.mxu1 %v6283_v34  ;;  %v6341_v34 = vld [vmem:[#allocation2 + $0xdc8] ss:$12 sps:$4 sm:$0xff]  }
 0x106   :  { %4321 = vmatpush2.bf16.msra.mxu0 %v6278_v36  ;;  %v6346_v36 = vld [vmem:[#allocation2 + $0xc34] ss:$12 sps:$4 sm:$0xff]  }
 0x107   :  { %4364 = vmatpush2.bf16.msra.mxu1 %v6281_v37  ;;  %4322 = vmatprep.subr.bf16.mxu0 %v6286_v38  ;;  %v6349_v37 = vld [vmem:[#allocation2 + $0xdb4] ss:$12 sps:$4 sm:$0xff]   ;;  %v6344_v38 = vld [vmem:[#allocation2 + $0xc30] ss:$12 sps:$4 sm:$0xff]  }
 0x108   :  { %4365 = vmatprep.subr.bf16.mxu1 %v6289_v39  ;;  %v6347_v39 = vld [vmem:[#allocation2 + $0xdb0] ss:$12 sps:$4 sm:$0xff]  }
 0x10a   :  { %4323 = vmatpush2.bf16.msra.mxu0 %v6284_v40  ;;  %v6352_v40 = vld [vmem:[#allocation2 + $0xc1c] ss:$12 sps:$4 sm:$0xff]  }
 0x10b   :  { %4366 = vmatpush2.bf16.msra.mxu1 %v6287_v42  ;;  %4324 = vmatprep.subr.bf16.mxu0 %v6292_v45  ;;  %v6355_v42 = vld [vmem:[#allocation2 + $0xd9c] ss:$12 sps:$4 sm:$0xff]   ;;  %v6350_v45 = vld [vmem:[#allocation2 + $0xc18] ss:$12 sps:$4 sm:$0xff]  }
 0x10c   :  { %4367 = vmatprep.subr.bf16.mxu1 %v6295_v51  ;;  %v6353_v51 = vld [vmem:[#allocation2 + $0xd98] ss:$12 sps:$4 sm:$0xff]  }
 0x10e   :  { %4325 = vmatpush2.bf16.msra.mxu0 %v6290_v52  ;;  %v6358_v52 = vld [vmem:[#allocation2 + $0xc04] ss:$12 sps:$4 sm:$0xff]  }
 0x10f   :  { %4368 = vmatpush2.bf16.msra.mxu1 %v6293_v54  ;;  %4326 = vmatprep.subr.bf16.mxu0 %v6298_v30  ;;  %v6361_v54 = vld [vmem:[#allocation2 + $0xd84] ss:$12 sps:$4 sm:$0xff]   ;;  %v6356_v30 = vld [vmem:[#allocation2 + $0xc00] ss:$12 sps:$4 sm:$0xff]  }
 0x110   :  { %4369 = vmatprep.subr.bf16.mxu1 %v6301_v31  ;;  %v6359_v31 = vld [vmem:[#allocation2 + $0xd80] ss:$12 sps:$4 sm:$0xff]  }
 0x112   :  { %4327 = vmatpush2.bf16.msra.mxu0 %v6296_v56  ;;  %v6364_v56 = vld [vmem:[#allocation2 + $0xd6c] ss:$12 sps:$4 sm:$0xff]  }
 0x113   :  { %4370 = vmatpush2.bf16.msra.mxu1 %v6299_v57  ;;  %4328 = vmatprep.subr.bf16.mxu0 %v6304_v58  ;;  %v6367_v57 = vld [vmem:[#allocation2 + $0xeec] ss:$12 sps:$4 sm:$0xff]   ;;  %v6362_v58 = vld [vmem:[#allocation2 + $0xd68] ss:$12 sps:$4 sm:$0xff]  }
 0x114   :  { %4371 = vmatprep.subr.bf16.mxu1 %v6307_v59  ;;  %v6365_v59 = vld [vmem:[#allocation2 + $0xee8] ss:$12 sps:$4 sm:$0xff]  }
 0x116   :  { %4329 = vmatpush2.bf16.msra.mxu0 %v6302_v60  ;;  %v6370_v60 = vld [vmem:[#allocation2 + $0xd54] ss:$12 sps:$4 sm:$0xff]  }
 0x117   :  { %4372 = vmatpush2.bf16.msra.mxu1 %v6305_v61  ;;  %4330 = vmatprep.subr.bf16.mxu0 %v6310_v62  ;;  %v6373_v61 = vld [vmem:[#allocation2 + $0xed4] ss:$12 sps:$4 sm:$0xff]   ;;  %v6368_v62 = vld [vmem:[#allocation2 + $0xd50] ss:$12 sps:$4 sm:$0xff]  }
 0x118   :  { %4373 = vmatprep.subr.bf16.mxu1 %v6313_v63  ;;  %v6371_v63 = vld [vmem:[#allocation2 + $0xed0] ss:$12 sps:$4 sm:$0xff]  }
 0x11a   :  { %4331 = vmatpush2.bf16.msra.mxu0 %v6308_v0  ;;  %v6376_v0 = vld [vmem:[#allocation2 + $0xd3c] ss:$12 sps:$4 sm:$0xff]  }
 0x11b   :  { %4374 = vmatpush2.bf16.msra.mxu1 %v6311_v1  ;;  %4386 = vmatprep.subr.bf16.mxu0 %v6316_v2  ;;  %v6379_v1 = vld [vmem:[#allocation2 + $0xebc] ss:$12 sps:$4 sm:$0xff]   ;;  %v6374_v2 = vld [vmem:[#allocation2 + $0xd38] ss:$12 sps:$4 sm:$0xff]  }
 0x11c   :  { %4429 = vmatprep.subr.bf16.mxu1 %v6319_v3  ;;  %v6377_v3 = vld [vmem:[#allocation2 + $0xeb8] ss:$12 sps:$4 sm:$0xff]  }
 0x11d   :  { %4333 = vmatmul.mubr.bf16.vlgmr.msra.gmra.mxu0 %v6923_v10 }
 0x11e   :  { %4376 = vmatmul.mubr.bf16.vlgmr.msra.gmra.mxu1 %v6927_v11  ;;  %4387 = vmatpush1.bf16.msra.mxu0 %v6314_v5  ;;  %v6382_v5 = vld [vmem:[#allocation2 + $0xd24] ss:$12 sps:$4 sm:$0xff]  }
 0x11f   :  { %4430 = vmatpush1.bf16.msra.mxu1 %v6317_v13  ;;  %4388 = vmatprep.subr.bf16.mxu0 %v6322_v14  ;;  %v6385_v13 = vld [vmem:[#allocation2 + $0xea4] ss:$12 sps:$4 sm:$0xff]   ;;  %v6380_v14 = vld [vmem:[#allocation2 + $0xd20] ss:$12 sps:$4 sm:$0xff]  }
 0x120   :  { %4431 = vmatprep.subr.bf16.mxu1 %v6325_v15  ;;  %4418 = vmatprep.mubr.bf16.mxu0 %v6936_v44  ;;  %v6383_v15 = vld [vmem:[#allocation2 + $0xea0] ss:$12 sps:$4 sm:$0xff]  }
 0x121   :  { %4461 = vmatprep.mubr.bf16.mxu1 %v6940_v46 }
 0x122   :  { %4389 = vmatpush1.bf16.msra.mxu0 %v6320_v47  ;;  %v6388_v47 = vld [vmem:[#allocation2 + $0xd0c] ss:$12 sps:$4 sm:$0xff]  }
 0x123   :  { %4432 = vmatpush1.bf16.msra.mxu1 %v6323_v50  ;;  %4390 = vmatprep.subr.bf16.mxu0 %v6328_v16  ;;  %v6391_v50 = vld [vmem:[#allocation2 + $0xe8c] ss:$12 sps:$4 sm:$0xff]   ;;  %v6386_v16 = vld [vmem:[#allocation2 + $0xd08] ss:$12 sps:$4 sm:$0xff]  }
 0x124   :  { %4433 = vmatprep.subr.bf16.mxu1 %v6331_v17  ;;  %v6389_v17 = vld [vmem:[#allocation2 + $0xe88] ss:$12 sps:$4 sm:$0xff]  }
 0x126   :  { %4391 = vmatpush1.bf16.msra.mxu0 %v6326_v18  ;;  %v6394_v18 = vld [vmem:[#allocation2 + $0xcf4] ss:$12 sps:$4 sm:$0xff]  }
 0x127   :  { %4434 = vmatpush1.bf16.msra.mxu1 %v6329_v19  ;;  %4392 = vmatprep.subr.bf16.mxu0 %v6334_v22  ;;  %v6397_v19 = vld [vmem:[#allocation2 + $0xe74] ss:$12 sps:$4 sm:$0xff]   ;;  %v6392_v22 = vld [vmem:[#allocation2 + $0xcf0] ss:$12 sps:$4 sm:$0xff]  }
 0x128   :  { %4435 = vmatprep.subr.bf16.mxu1 %v6337_v23  ;;  %v6395_v23 = vld [vmem:[#allocation2 + $0xe70] ss:$12 sps:$4 sm:$0xff]  }
 0x12a   :  { %4393 = vmatpush1.bf16.msra.mxu0 %v6332_v24  ;;  %v6400_v24 = vld [vmem:[#allocation2 + $0xcdc] ss:$12 sps:$4 sm:$0xff]  }
 0x12b   :  { %4436 = vmatpush1.bf16.msra.mxu1 %v6335_v25  ;;  %4394 = vmatprep.subr.bf16.mxu0 %v6340_v26  ;;  %v6403_v25 = vld [vmem:[#allocation2 + $0xe5c] ss:$12 sps:$4 sm:$0xff]   ;;  %v6398_v26 = vld [vmem:[#allocation2 + $0xcd8] ss:$12 sps:$4 sm:$0xff]  }
 0x12c   :  { %4437 = vmatprep.subr.bf16.mxu1 %v6343_v27  ;;  %v6401_v27 = vld [vmem:[#allocation2 + $0xe58] ss:$12 sps:$4 sm:$0xff]  }
 0x12e   :  { %4395 = vmatpush1.bf16.msra.mxu0 %v6338_v32  ;;  %v6406_v32 = vld [vmem:[#allocation2 + $0xcc4] ss:$12 sps:$4 sm:$0xff]  }
 0x12f   :  { %4438 = vmatpush1.bf16.msra.mxu1 %v6341_v34  ;;  %4396 = vmatprep.subr.bf16.mxu0 %v6346_v36  ;;  %v6409_v34 = vld [vmem:[#allocation2 + $0xe44] ss:$12 sps:$4 sm:$0xff]   ;;  %v6404_v36 = vld [vmem:[#allocation2 + $0xcc0] ss:$12 sps:$4 sm:$0xff]  }
 0x130   :  { %4439 = vmatprep.subr.bf16.mxu1 %v6349_v37  ;;  %v6407_v37 = vld [vmem:[#allocation2 + $0xe40] ss:$12 sps:$4 sm:$0xff]  }
 0x132   :  { %4397 = vmatpush1.bf16.msra.mxu0 %v6344_v38  ;;  %v6412_v38 = vld [vmem:[#allocation2 + $0xfac] ss:$12 sps:$4 sm:$0xff]  }
 0x133   :  { %4440 = vmatpush1.bf16.msra.mxu1 %v6347_v39  ;;  %4398 = vmatprep.subr.bf16.mxu0 %v6352_v40  ;;  %v6415_v39 = vld [vmem:[#allocation2 + $0x112c] ss:$12 sps:$4 sm:$0xff]   ;;  %v6949_v40 = vld [vmem:[%s7129_s0 + $0x50] sm:$0xff] }
 0x134   :  { %4441 = vmatprep.subr.bf16.mxu1 %v6355_v42  ;;  %v6954_v42 = vld [vmem:[%s7129_s0 + $0xb0] sm:$0xff] }
 0x136   :  { %4399 = vmatpush1.bf16.msra.mxu0 %v6350_v45  ;;  %v6410_v45 = vld [vmem:[#allocation2 + $0xfa8] ss:$12 sps:$4 sm:$0xff]  }
 0x137   :  { %4442 = vmatpush1.bf16.msra.mxu1 %v6353_v51  ;;  %4400 = vmatprep.subr.bf16.mxu0 %v6358_v52  ;;  %v6413_v51 = vld [vmem:[#allocation2 + $0x1128] ss:$12 sps:$4 sm:$0xff]   ;;  %v6959_v52 = vld [vmem:[%s7129_s0 + $0x58] sm:$0xff] }
 0x138   :  { %4443 = vmatprep.subr.bf16.mxu1 %v6361_v54  ;;  %v6963_v54 = vcombine.low %v6909_v4, %v6914_v6  ;;  %v6976_v4 = vcombine.high %v6949_v40, %v6954_v42 }
 0x13a   :  { %4401 = vmatpush1.bf16.msra.mxu0 %v6356_v30  ;;  %v6967_v30 = vcombine.low %v6919_v7, %v6932_v12  ;;  %v6419_v7 = vld [vmem:[#allocation2 + $0x1110] ss:$12 sps:$4 sm:$0xff]  }
 0x13b   :  { %4444 = vmatpush1.bf16.msra.mxu1 %v6359_v31  ;;  %4402 = vmatprep.subr.bf16.mxu0 %v6364_v56  ;;  %v6972_v31 = vld [vmem:[%s7129_s0 + $0xb8] sm:$0xff]  ;;  %v6418_v56 = vld [vmem:[#allocation2 + $0xf94] ss:$12 sps:$4 sm:$0xff]  }
 0x13c   :  { %4445 = vmatprep.subr.bf16.mxu1 %v6367_v57  ;;  %v6421_v57 = vld [vmem:[#allocation2 + $0x1114] ss:$12 sps:$4 sm:$0xff]   ;;  %v6980_v6 = vcombine.high %v6959_v52, %v6972_v31  ;;  %v6424_v12 = vld [vmem:[#allocation2 + $0xf7c] ss:$12 sps:$4 sm:$0xff]  }
 0x13e   :  { %4403 = vmatpush2.bf16.msra.mxu0 %v6362_v58  ;;  %v6416_v58 = vld [vmem:[#allocation2 + $0xf90] ss:$12 sps:$4 sm:$0xff]  }
 0x13f   :  { %4446 = vmatpush2.bf16.msra.mxu1 %v6365_v59  ;;  %4404 = vmatprep.subr.bf16.mxu0 %v6370_v60  ;;  %v6427_v59 = vld [vmem:[#allocation2 + $0x10fc] ss:$12 sps:$4 sm:$0xff]   ;;  %v6422_v60 = vld [vmem:[#allocation2 + $0xf78] ss:$12 sps:$4 sm:$0xff]  }
 0x140   :  { %4447 = vmatprep.subr.bf16.mxu1 %v6373_v61  ;;  %v6425_v61 = vld [vmem:[#allocation2 + $0x10f8] ss:$12 sps:$4 sm:$0xff]  }
 0x142   :  { %4405 = vmatpush2.bf16.msra.mxu0 %v6368_v62  ;;  %v6430_v62 = vld [vmem:[#allocation2 + $0xf64] ss:$12 sps:$4 sm:$0xff]  }
 0x143   :  { %4448 = vmatpush2.bf16.msra.mxu1 %v6371_v63  ;;  %4406 = vmatprep.subr.bf16.mxu0 %v6376_v0  ;;  %v6433_v63 = vld [vmem:[#allocation2 + $0x10e4] ss:$12 sps:$4 sm:$0xff]   ;;  %v6428_v0 = vld [vmem:[#allocation2 + $0xf60] ss:$12 sps:$4 sm:$0xff]  }
 0x144   :  { %4449 = vmatprep.subr.bf16.mxu1 %v6379_v1  ;;  %v6431_v1 = vld [vmem:[#allocation2 + $0x10e0] ss:$12 sps:$4 sm:$0xff]  }
 0x146   :  { %4407 = vmatpush2.bf16.msra.mxu0 %v6374_v2  ;;  %v6436_v2 = vld [vmem:[#allocation2 + $0xf4c] ss:$12 sps:$4 sm:$0xff]  }
 0x147   :  { %4450 = vmatpush2.bf16.msra.mxu1 %v6377_v3  ;;  %4408 = vmatprep.subr.bf16.mxu0 %v6382_v5  ;;  %v6439_v3 = vld [vmem:[#allocation2 + $0x10cc] ss:$12 sps:$4 sm:$0xff]   ;;  %v6434_v5 = vld [vmem:[#allocation2 + $0xf48] ss:$12 sps:$4 sm:$0xff]  }
 0x148   :  { %4451 = vmatprep.subr.bf16.mxu1 %v6385_v13  ;;  %v6437_v13 = vld [vmem:[#allocation2 + $0x10c8] ss:$12 sps:$4 sm:$0xff]  }
 0x14a   :  { %4409 = vmatpush2.bf16.msra.mxu0 %v6380_v14  ;;  %v6442_v14 = vld [vmem:[#allocation2 + $0xf34] ss:$12 sps:$4 sm:$0xff]  }
 0x14b   :  { %4452 = vmatpush2.bf16.msra.mxu1 %v6383_v15  ;;  %4410 = vmatprep.subr.bf16.mxu0 %v6388_v47  ;;  %v6445_v15 = vld [vmem:[#allocation2 + $0x10b4] ss:$12 sps:$4 sm:$0xff]   ;;  %v6440_v47 = vld [vmem:[#allocation2 + $0xf30] ss:$12 sps:$4 sm:$0xff]  }
 0x14c   :  { %4453 = vmatprep.subr.bf16.mxu1 %v6391_v50  ;;  %v6443_v50 = vld [vmem:[#allocation2 + $0x10b0] ss:$12 sps:$4 sm:$0xff]  }
 0x14e   :  { %4411 = vmatpush2.bf16.msra.mxu0 %v6386_v16  ;;  %v6448_v16 = vld [vmem:[#allocation2 + $0xf1c] ss:$12 sps:$4 sm:$0xff]  }
 0x14f   :  { %4454 = vmatpush2.bf16.msra.mxu1 %v6389_v17  ;;  %4412 = vmatprep.subr.bf16.mxu0 %v6394_v18  ;;  %v6451_v17 = vld [vmem:[#allocation2 + $0x109c] ss:$12 sps:$4 sm:$0xff]   ;;  %v6446_v18 = vld [vmem:[#allocation2 + $0xf18] ss:$12 sps:$4 sm:$0xff]  }
 0x150   :  { %4455 = vmatprep.subr.bf16.mxu1 %v6397_v19  ;;  %v6449_v19 = vld [vmem:[#allocation2 + $0x1098] ss:$12 sps:$4 sm:$0xff]  }
 0x152   :  { %4413 = vmatpush2.bf16.msra.mxu0 %v6392_v22  ;;  %v6454_v22 = vld [vmem:[#allocation2 + $0xf04] ss:$12 sps:$4 sm:$0xff]  }
 0x153   :  { %4456 = vmatpush2.bf16.msra.mxu1 %v6395_v23  ;;  %4414 = vmatprep.subr.bf16.mxu0 %v6400_v24  ;;  %v6457_v23 = vld [vmem:[#allocation2 + $0x1084] ss:$12 sps:$4 sm:$0xff]   ;;  %v6452_v24 = vld [vmem:[#allocation2 + $0xf00] ss:$12 sps:$4 sm:$0xff]  }
 0x154   :  { %4457 = vmatprep.subr.bf16.mxu1 %v6403_v25  ;;  %v6455_v25 = vld [vmem:[#allocation2 + $0x1080] ss:$12 sps:$4 sm:$0xff]  }
 0x156   :  { %4415 = vmatpush2.bf16.msra.mxu0 %v6398_v26  ;;  %v6460_v26 = vld [vmem:[#allocation2 + $0x106c] ss:$12 sps:$4 sm:$0xff]  }
 0x157   :  { %4458 = vmatpush2.bf16.msra.mxu1 %v6401_v27  ;;  %4416 = vmatprep.subr.bf16.mxu0 %v6406_v32  ;;  %v6463_v27 = vld [vmem:[#allocation2 + $0x11ec] ss:$12 sps:$4 sm:$0xff]   ;;  %v6458_v32 = vld [vmem:[#allocation2 + $0x1068] ss:$12 sps:$4 sm:$0xff]  }
 0x158   :  { %4459 = vmatprep.subr.bf16.mxu1 %v6409_v34  ;;  %v6461_v34 = vld [vmem:[#allocation2 + $0x11e8] ss:$12 sps:$4 sm:$0xff]  }
 0x15a   :  { %4417 = vmatpush2.bf16.msra.mxu0 %v6404_v36  ;;  %v6466_v36 = vld [vmem:[#allocation2 + $0x1054] ss:$12 sps:$4 sm:$0xff]  }
 0x15b   :  { %4460 = vmatpush2.bf16.msra.mxu1 %v6407_v37  ;;  %4472 = vmatprep.subr.bf16.mxu0 %v6412_v38  ;;  %v6469_v37 = vld [vmem:[#allocation2 + $0x11d4] ss:$12 sps:$4 sm:$0xff]   ;;  %v6464_v38 = vld [vmem:[#allocation2 + $0x1050] ss:$12 sps:$4 sm:$0xff]  }
 0x15c   :  { %4515 = vmatprep.subr.bf16.mxu1 %v6415_v39  ;;  %v6467_v39 = vld [vmem:[#allocation2 + $0x11d0] ss:$12 sps:$4 sm:$0xff]  }
 0x15d   :  { %4419 = vmatmul.mubr.bf16.vlgmr.msra.gmra.mxu0 %v6963_v54 }
 0x15e   :  { %4462 = vmatmul.mubr.bf16.vlgmr.msra.gmra.mxu1 %v6967_v30  ;;  %4473 = vmatpush1.bf16.msra.mxu0 %v6410_v45  ;;  %v6472_v45 = vld [vmem:[#allocation2 + $0x103c] ss:$12 sps:$4 sm:$0xff]  }
 0x15f   :  { %4516 = vmatpush1.bf16.msra.mxu1 %v6413_v51  ;;  %4474 = vmatprep.subr.bf16.mxu0 %v6418_v56  ;;  %v6475_v51 = vld [vmem:[#allocation2 + $0x11bc] ss:$12 sps:$4 sm:$0xff]   ;;  %v6470_v56 = vld [vmem:[#allocation2 + $0x1038] ss:$12 sps:$4 sm:$0xff]  }
 0x160   :  { %4517 = vmatprep.subr.bf16.mxu1 %v6421_v57  ;;  %4504 = vmatprep.mubr.bf16.mxu0 %v6976_v4  ;;  %v6473_v57 = vld [vmem:[#allocation2 + $0x11b8] ss:$12 sps:$4 sm:$0xff]  }
 0x161   :  { %4547 = vmatprep.mubr.bf16.mxu1 %v6980_v6 }
 0x162   :  { %4475 = vmatpush1.bf16.msra.mxu0 %v6416_v58  ;;  %v6478_v58 = vld [vmem:[#allocation2 + $0x1024] ss:$12 sps:$4 sm:$0xff]  }
 0x163   :  { %4518 = vmatpush1.bf16.msra.mxu1 %v6419_v7  ;;  %4476 = vmatprep.subr.bf16.mxu0 %v6424_v12  ;;  %v6481_v7 = vld [vmem:[#allocation2 + $0x11a4] ss:$12 sps:$4 sm:$0xff]   ;;  %v6476_v12 = vld [vmem:[#allocation2 + $0x1020] ss:$12 sps:$4 sm:$0xff]  }
 0x164   :  { %4519 = vmatprep.subr.bf16.mxu1 %v6427_v59  ;;  %v6479_v59 = vld [vmem:[#allocation2 + $0x11a0] ss:$12 sps:$4 sm:$0xff]  }
 0x166   :  { %4477 = vmatpush1.bf16.msra.mxu0 %v6422_v60  ;;  %v6484_v60 = vld [vmem:[#allocation2 + $0x100c] ss:$12 sps:$4 sm:$0xff]  }
 0x167   :  { %4520 = vmatpush1.bf16.msra.mxu1 %v6425_v61  ;;  %4478 = vmatprep.subr.bf16.mxu0 %v6430_v62  ;;  %v6487_v61 = vld [vmem:[#allocation2 + $0x118c] ss:$12 sps:$4 sm:$0xff]   ;;  %v6482_v62 = vld [vmem:[#allocation2 + $0x1008] ss:$12 sps:$4 sm:$0xff]  }
 0x168   :  { %4521 = vmatprep.subr.bf16.mxu1 %v6433_v63  ;;  %v6485_v63 = vld [vmem:[#allocation2 + $0x1188] ss:$12 sps:$4 sm:$0xff]  }
 0x16a   :  { %4479 = vmatpush1.bf16.msra.mxu0 %v6428_v0  ;;  %v6490_v0 = vld [vmem:[#allocation2 + $0xff4] ss:$12 sps:$4 sm:$0xff]  }
 0x16b   :  { %4522 = vmatpush1.bf16.msra.mxu1 %v6431_v1  ;;  %4480 = vmatprep.subr.bf16.mxu0 %v6436_v2  ;;  %v6493_v1 = vld [vmem:[#allocation2 + $0x1174] ss:$12 sps:$4 sm:$0xff]   ;;  %v6488_v2 = vld [vmem:[#allocation2 + $0xff0] ss:$12 sps:$4 sm:$0xff]  }
 0x16c   :  { %4523 = vmatprep.subr.bf16.mxu1 %v6439_v3  ;;  %v6491_v3 = vld [vmem:[#allocation2 + $0x1170] ss:$12 sps:$4 sm:$0xff]  }
 0x16e   :  { %4481 = vmatpush1.bf16.msra.mxu0 %v6434_v5  ;;  %v6496_v5 = vld [vmem:[#allocation2 + $0xfdc] ss:$12 sps:$4 sm:$0xff]  }
 0x16f   :  { %4524 = vmatpush1.bf16.msra.mxu1 %v6437_v13  ;;  %4482 = vmatprep.subr.bf16.mxu0 %v6442_v14  ;;  %v6499_v13 = vld [vmem:[#allocation2 + $0x115c] ss:$12 sps:$4 sm:$0xff]   ;;  %v6494_v14 = vld [vmem:[#allocation2 + $0xfd8] ss:$12 sps:$4 sm:$0xff]  }
 0x170   :  { %4525 = vmatprep.subr.bf16.mxu1 %v6445_v15  ;;  %v6497_v15 = vld [vmem:[#allocation2 + $0x1158] ss:$12 sps:$4 sm:$0xff]  }
 0x172   :  { %4483 = vmatpush1.bf16.msra.mxu0 %v6440_v47  ;;  %v6502_v47 = vld [vmem:[#allocation2 + $0xfc4] ss:$12 sps:$4 sm:$0xff]  }
 0x173   :  { %4526 = vmatpush1.bf16.msra.mxu1 %v6443_v50  ;;  %4484 = vmatprep.subr.bf16.mxu0 %v6448_v16  ;;  %v6505_v50 = vld [vmem:[#allocation2 + $0x1144] ss:$12 sps:$4 sm:$0xff]   ;;  %v6500_v16 = vld [vmem:[#allocation2 + $0xfc0] ss:$12 sps:$4 sm:$0xff]  }
 0x174   :  { %4527 = vmatprep.subr.bf16.mxu1 %v6451_v17  ;;  %v6503_v17 = vld [vmem:[#allocation2 + $0x1140] ss:$12 sps:$4 sm:$0xff]  }
 0x176   :  { %4485 = vmatpush1.bf16.msra.mxu0 %v6446_v18  ;;  %v6506_v18 = vld [vmem:[#allocation2 + $0x170] ss:$12 sps:$4 sm:$0xff]  }
 0x177   :  { %4528 = vmatpush1.bf16.msra.mxu1 %v6449_v19  ;;  %4486 = vmatprep.subr.bf16.mxu0 %v6454_v22  ;;  %v6507_v19 = vld [vmem:[#allocation2 + $0x2f0] ss:$12 sps:$4 sm:$0xff]  }
 0x178   :  { %4529 = vmatprep.subr.bf16.mxu1 %v6457_v23  ;;  %v6508_v22 = vld [vmem:[#allocation2 + $0xb0] ss:$12 sps:$4 sm:$0xff]   ;;  %v6988_v23 = vcombine.low %v6949_v40, %v6954_v42  ;;  %v6514_v40 = vld [vmem:[#allocation2 + $0x140] ss:$12 sps:$4 sm:$0xff]  }
 0x179   :  { %v6515_v42 = vld [vmem:[#allocation2 + $0x2c0] ss:$12 sps:$4 sm:$0xff]  }
 0x17a   :  { %4487 = vmatpush1.bf16.msra.mxu0 %v6452_v24  ;;  %v6992_v24 = vcombine.low %v6959_v52, %v6972_v31  ;;  %v6516_v52 = vld [vmem:[#allocation2 + $0x80] ss:$12 sps:$4 sm:$0xff]  }
 0x17b   :  { %4530 = vmatpush1.bf16.msra.mxu1 %v6455_v25  ;;  %4488 = vmatprep.subr.bf16.mxu0 %v6460_v26  ;;  %v6509_v25 = vld [vmem:[#allocation2 + $0x230] ss:$12 sps:$4 sm:$0xff]   ;;  %v6510_v26 = vld [vmem:[#allocation2 + $0x158] ss:$12 sps:$4 sm:$0xff]   ;;  %v6517_v31 = vld [vmem:[#allocation2 + $0x200] ss:$12 sps:$4 sm:$0xff]  }
 0x17c   :  { %4531 = vmatprep.subr.bf16.mxu1 %v6463_v27  ;;  %v6511_v27 = vld [vmem:[#allocation2 + $0x2d8] ss:$12 sps:$4 sm:$0xff]  }
 0x17e   :  { %4489 = vmatpush2.bf16.msra.mxu0 %v6458_v32  ;;  %v6512_v32 = vld [vmem:[#allocation2 + $0x98] ss:$12 sps:$4 sm:$0xff]  }
 0x17f   :  { %4532 = vmatpush2.bf16.msra.mxu1 %v6461_v34  ;;  %4490 = vmatprep.subr.bf16.mxu0 %v6466_v36  ;;  %v6513_v34 = vld [vmem:[#allocation2 + $0x218] ss:$12 sps:$4 sm:$0xff]   ;;  %v6518_v36 = vld [vmem:[#allocation2 + $0x128] ss:$12 sps:$4 sm:$0xff]  }
 0x180   :  { %4533 = vmatprep.subr.bf16.mxu1 %v6469_v37  ;;  %v6519_v37 = vld [vmem:[#allocation2 + $0x2a8] ss:$12 sps:$4 sm:$0xff]  }
 0x182   :  { %4491 = vmatpush2.bf16.msra.mxu0 %v6464_v38  ;;  %v6520_v38 = vld [vmem:[#allocation2 + $0x68] ss:$12 sps:$4 sm:$0xff]  }
 0x183   :  { %4534 = vmatpush2.bf16.msra.mxu1 %v6467_v39  ;;  %4492 = vmatprep.subr.bf16.mxu0 %v6472_v45  ;;  %v6521_v39 = vld [vmem:[#allocation2 + $0x1e8] ss:$12 sps:$4 sm:$0xff]   ;;  %v6522_v45 = vld [vmem:[#allocation2 + $0x110] ss:$12 sps:$4 sm:$0xff]  }
 0x184   :  { %4535 = vmatprep.subr.bf16.mxu1 %v6475_v51  ;;  %v6523_v51 = vld [vmem:[#allocation2 + $0x290] ss:$12 sps:$4 sm:$0xff]  }
 0x186   :  { %4493 = vmatpush2.bf16.msra.mxu0 %v6470_v56  ;;  %v6524_v56 = vld [vmem:[#allocation2 + $0x50] ss:$12 sps:$4 sm:$0xff]  }
 0x187   :  { %4536 = vmatpush2.bf16.msra.mxu1 %v6473_v57  ;;  %4494 = vmatprep.subr.bf16.mxu0 %v6478_v58  ;;  %v6525_v57 = vld [vmem:[#allocation2 + $0x1d0] ss:$12 sps:$4 sm:$0xff]   ;;  %v6528_v58 = vld [vmem:[#allocation2 + $0x38] ss:$12 sps:$4 sm:$0xff]  }
 0x188   :  { %4537 = vmatprep.subr.bf16.mxu1 %v6481_v7  ;;  %v6529_v7 = vld [vmem:[#allocation2 + $0x1b8] ss:$12 sps:$4 sm:$0xff]  }
 0x18a   :  { %4495 = vmatpush2.bf16.msra.mxu0 %v6476_v12  ;;  %v6530_v12 = vld [vmem:[#allocation2 + $0xe0] ss:$12 sps:$4 sm:$0xff]  }
 0x18b   :  { %4538 = vmatpush2.bf16.msra.mxu1 %v6479_v59  ;;  %4496 = vmatprep.subr.bf16.mxu0 %v6484_v60  ;;  %v6531_v59 = vld [vmem:[#allocation2 + $0x260] ss:$12 sps:$4 sm:$0xff]  }
 0x18c   :  { %4539 = vmatprep.subr.bf16.mxu1 %v6487_v61  ;;  %v6532_v60 = vld [vmem:[#allocation2 + $0x20] ss:$12 sps:$4 sm:$0xff]  }
 0x18d   :  { %v6533_v61 = vld [vmem:[#allocation2 + $0x1a0] ss:$12 sps:$4 sm:$0xff]  }
 0x18e   :  { %4497 = vmatpush2.bf16.msra.mxu0 %v6482_v62  ;;  %v6534_v62 = vld [vmem:[#allocation2 + $0xc8] ss:$12 sps:$4 sm:$0xff]  }
 0x18f   :  { %4540 = vmatpush2.bf16.msra.mxu1 %v6485_v63  ;;  %4498 = vmatprep.subr.bf16.mxu0 %v6490_v0  ;;  %v6535_v63 = vld [vmem:[#allocation2 + $0x248] ss:$12 sps:$4 sm:$0xff]  }
 0x190   :  { %4541 = vmatprep.subr.bf16.mxu1 %v6493_v1  ;;  %v6536_v0 = vld [vmem:[#allocation2 + $0x8] ss:$12 sps:$4 sm:$0xff]  }
 0x191   :  { %v6537_v1 = vld [vmem:[#allocation2 + $0x188] ss:$12 sps:$4 sm:$0xff]  }
 0x192   :  { %4499 = vmatpush2.bf16.msra.mxu0 %v6488_v2  ;;  %v6538_v2 = vld [vmem:[#allocation2 + $0x470] ss:$12 sps:$4 sm:$0xff]  }
 0x193   :  { %4542 = vmatpush2.bf16.msra.mxu1 %v6491_v3  ;;  %4500 = vmatprep.subr.bf16.mxu0 %v6496_v5  ;;  %v6539_v3 = vld [vmem:[#allocation2 + $0x5f0] ss:$12 sps:$4 sm:$0xff]  }
 0x194   :  { %4543 = vmatprep.subr.bf16.mxu1 %v6499_v13  ;;  %v6540_v5 = vld [vmem:[#allocation2 + $0x3b0] ss:$12 sps:$4 sm:$0xff]  }
 0x195   :  { %v6541_v13 = vld [vmem:[#allocation2 + $0x530] ss:$12 sps:$4 sm:$0xff]  }
 0x196   :  { %4501 = vmatpush2.bf16.msra.mxu0 %v6494_v14  ;;  %v6542_v14 = vld [vmem:[#allocation2 + $0x458] ss:$12 sps:$4 sm:$0xff]  }
 0x197   :  { %4544 = vmatpush2.bf16.msra.mxu1 %v6497_v15  ;;  %4502 = vmatprep.subr.bf16.mxu0 %v6502_v47  ;;  %v6543_v15 = vld [vmem:[#allocation2 + $0x5d8] ss:$12 sps:$4 sm:$0xff]  }
 0x198   :  { %4545 = vmatprep.subr.bf16.mxu1 %v6505_v50  ;;  %v6544_v47 = vld [vmem:[#allocation2 + $0x398] ss:$12 sps:$4 sm:$0xff]  }
 0x199   :  { %v6545_v50 = vld [vmem:[#allocation2 + $0x518] ss:$12 sps:$4 sm:$0xff]  }
 0x19a   :  { %4503 = vmatpush2.bf16.msra.mxu0 %v6500_v16  ;;  %v6546_v16 = vld [vmem:[#allocation2 + $0x440] ss:$12 sps:$4 sm:$0xff]  }
 0x19b   :  { %4546 = vmatpush2.bf16.msra.mxu1 %v6503_v17  ;;  %5662 = vmatprep.subr.bf16.mxu0 %v6506_v18  ;;  %v6547_v17 = vld [vmem:[#allocation2 + $0x5c0] ss:$12 sps:$4 sm:$0xff]  }
 0x19c   :  { %5684 = vmatprep.subr.bf16.mxu1 %v6507_v19  ;;  %v6548_v18 = vld [vmem:[#allocation2 + $0x380] ss:$12 sps:$4 sm:$0xff]  }
 0x19d   :  { %4505 = vmatmul.mubr.bf16.vlgmr.msra.gmra.mxu0 %v6988_v23  ;;  %v6549_v19 = vld [vmem:[#allocation2 + $0x500] ss:$12 sps:$4 sm:$0xff]  }
 0x19e   :  { %4548 = vmatmul.mubr.bf16.vlgmr.msra.gmra.mxu1 %v6992_v24  ;;  %5663 = vmatpush3.bf16.msra.mxu0 %v6508_v22  ;;  %v6550_v22 = vld [vmem:[#allocation2 + $0x428] ss:$12 sps:$4 sm:$0xff]  }
 0x19f   :  { %5685 = vmatpush3.bf16.msra.mxu1 %v6509_v25  ;;  %5664 = vmatprep.subr.bf16.mxu0 %v6510_v26  ;;  %v6553_v25 = vld [vmem:[#allocation2 + $0x4e8] ss:$12 sps:$4 sm:$0xff]   ;;  %v6554_v26 = vld [vmem:[#allocation2 + $0x410] ss:$12 sps:$4 sm:$0xff]  }
 0x1a0   :  { %5686 = vmatprep.subr.bf16.mxu1 %v6511_v27  ;;  %4590 = vmatprep.mubr.bf16.mxu0 %v6784_v53  ;;  %v6526_v53 = vld [vmem:[#allocation2 + $0xf8] ss:$12 sps:$4 sm:$0xff]   ;;  %v6555_v27 = vld [vmem:[#allocation2 + $0x590] ss:$12 sps:$4 sm:$0xff]  }
 0x1a1   :  { %4631 = vmatprep.mubr.bf16.mxu1 %v6786_v55  ;;  %v6527_v55 = vld [vmem:[#allocation2 + $0x278] ss:$12 sps:$4 sm:$0xff]  }
 0x1a2   :  { %5665 = vmatpush3.bf16.msra.mxu0 %v6512_v32  ;;  %v6556_v32 = vld [vmem:[#allocation2 + $0x350] ss:$12 sps:$4 sm:$0xff]  }
 0x1a3   :  { %5687 = vmatpush3.bf16.msra.mxu1 %v6513_v34  ;;  %5666 = vmatprep.subr.bf16.mxu0 %v6514_v40  ;;  %v6557_v34 = vld [vmem:[#allocation2 + $0x4d0] ss:$12 sps:$4 sm:$0xff]   ;;  %v6560_v40 = vld [vmem:[#allocation2 + $0x338] ss:$12 sps:$4 sm:$0xff]  }
 0x1a4   :  { %5688 = vmatprep.subr.bf16.mxu1 %v6515_v42  ;;  %v6561_v42 = vld [vmem:[#allocation2 + $0x4b8] ss:$12 sps:$4 sm:$0xff]  }
 0x1a6   :  { %5667 = vmatpush3.bf16.msra.mxu0 %v6516_v52  ;;  %v6562_v52 = vld [vmem:[#allocation2 + $0x3e0] ss:$12 sps:$4 sm:$0xff]  }
 0x1a7   :  { %5689 = vmatpush3.bf16.msra.mxu1 %v6517_v31  ;;  %5668 = vmatprep.subr.bf16.mxu0 %v6518_v36  ;;  %v6563_v31 = vld [vmem:[#allocation2 + $0x560] ss:$12 sps:$4 sm:$0xff]  }
 0x1a8   :  { %5690 = vmatprep.subr.bf16.mxu1 %v6519_v37  ;;  %v6564_v36 = vld [vmem:[#allocation2 + $0x320] ss:$12 sps:$4 sm:$0xff]  }
 0x1a9   :  { %v6565_v37 = vld [vmem:[#allocation2 + $0x4a0] ss:$12 sps:$4 sm:$0xff]  }
 0x1aa   :  { %5669 = vmatpush3.bf16.msra.mxu0 %v6520_v38  ;;  %v6566_v38 = vld [vmem:[#allocation2 + $0x3c8] ss:$12 sps:$4 sm:$0xff]  }
 0x1ab   :  { %5691 = vmatpush3.bf16.msra.mxu1 %v6521_v39  ;;  %5670 = vmatprep.subr.bf16.mxu0 %v6522_v45  ;;  %v6567_v39 = vld [vmem:[#allocation2 + $0x548] ss:$12 sps:$4 sm:$0xff]  }
 0x1ac   :  { %5692 = vmatprep.subr.bf16.mxu1 %v6523_v51  ;;  %v6568_v45 = vld [vmem:[#allocation2 + $0x308] ss:$12 sps:$4 sm:$0xff]  }
 0x1ad   :  { %v6569_v51 = vld [vmem:[#allocation2 + $0x488] ss:$12 sps:$4 sm:$0xff]  }
 0x1ae   :  { %5671 = vmatpush3.bf16.msra.mxu0 %v6524_v56  ;;  %v6570_v56 = vld [vmem:[#allocation2 + $0x770] ss:$12 sps:$4 sm:$0xff]  }
 0x1af   :  { %5693 = vmatpush3.bf16.msra.mxu1 %v6525_v57  ;;  %5672 = vmatprep.subr.bf16.mxu0 %v6526_v53  ;;  %v6571_v57 = vld [vmem:[#allocation2 + $0x8f0] ss:$12 sps:$4 sm:$0xff]  }
 0x1b0   :  { %5694 = vmatprep.subr.bf16.mxu1 %v6527_v55  ;;  %v6572_v53 = vld [vmem:[#allocation2 + $0x6b0] ss:$12 sps:$4 sm:$0xff]  }
 0x1b1   :  { %v6573_v55 = vld [vmem:[#allocation2 + $0x830] ss:$12 sps:$4 sm:$0xff]  }
 0x1b2   :  { %5673 = vmatpush3.bf16.msra.mxu0 %v6528_v58  ;;  %v6574_v58 = vld [vmem:[#allocation2 + $0x758] ss:$12 sps:$4 sm:$0xff]  }
 0x1b3   :  { %5695 = vmatpush3.bf16.msra.mxu1 %v6529_v7  ;;  %5674 = vmatprep.subr.bf16.mxu0 %v6530_v12  ;;  %v6575_v7 = vld [vmem:[#allocation2 + $0x8d8] ss:$12 sps:$4 sm:$0xff]  }
 0x1b4   :  { %5696 = vmatprep.subr.bf16.mxu1 %v6531_v59  ;;  %v6576_v12 = vld [vmem:[#allocation2 + $0x698] ss:$12 sps:$4 sm:$0xff]  }
 0x1b5   :  { %v6577_v59 = vld [vmem:[#allocation2 + $0x818] ss:$12 sps:$4 sm:$0xff]  }
 0x1b6   :  { %5675 = vmatpush3.bf16.msra.mxu0 %v6532_v60  ;;  %v6578_v60 = vld [vmem:[#allocation2 + $0x740] ss:$12 sps:$4 sm:$0xff]  }
 0x1b7   :  { %5697 = vmatpush3.bf16.msra.mxu1 %v6533_v61  ;;  %5676 = vmatprep.subr.bf16.mxu0 %v6534_v62  ;;  %v6579_v61 = vld [vmem:[#allocation2 + $0x8c0] ss:$12 sps:$4 sm:$0xff]  }
 0x1b8   :  { %5698 = vmatprep.subr.bf16.mxu1 %v6535_v63  ;;  %v6580_v62 = vld [vmem:[#allocation2 + $0x680] ss:$12 sps:$4 sm:$0xff]  }
 0x1b9   :  { %v6581_v63 = vld [vmem:[#allocation2 + $0x800] ss:$12 sps:$4 sm:$0xff]  }
 0x1ba   :  { %5677 = vmatpush3.bf16.msra.mxu0 %v6536_v0  ;;  %v6583_v0 = vld [vmem:[#allocation2 + $0x8a8] ss:$12 sps:$4 sm:$0xff]  }
 0x1bb   :  { %5699 = vmatpush3.bf16.msra.mxu1 %v6537_v1  ;;  %5706 = vmatprep.subr.bf16.mxu0 %v6538_v2  ;;  %v6585_v1 = vld [vmem:[#allocation2 + $0x7e8] ss:$12 sps:$4 sm:$0xff]   ;;  %v6586_v2 = vld [vmem:[#allocation2 + $0x710] ss:$12 sps:$4 sm:$0xff]  }
 0x1bc   :  { %5728 = vmatprep.subr.bf16.mxu1 %v6539_v3  ;;  %v6587_v3 = vld [vmem:[#allocation2 + $0x890] ss:$12 sps:$4 sm:$0xff]  }
 0x1bd   :  { %4591 = vmatmul.mubr.bf16.vlgmr.msra.gmra.mxu0 %v6790_v8  ;;  %v6551_v8 = vld [vmem:[#allocation2 + $0x5a8] ss:$12 sps:$4 sm:$0xff]  }
 0x1be   :  { %4632 = vmatmul.mubr.bf16.vlgmr.msra.gmra.mxu1 %v6792_v9  ;;  %5707 = vmatpush3.bf16.msra.mxu0 %v6540_v5  ;;  %v6552_v9 = vld [vmem:[#allocation2 + $0x368] ss:$12 sps:$4 sm:$0xff]   ;;  %v6590_v5 = vld [vmem:[#allocation2 + $0x6f8] ss:$12 sps:$4 sm:$0xff]  }
 0x1bf   :  { %5729 = vmatpush3.bf16.msra.mxu1 %v6541_v13  ;;  %5708 = vmatprep.subr.bf16.mxu0 %v6542_v14  ;;  %v6591_v13 = vld [vmem:[#allocation2 + $0x878] ss:$12 sps:$4 sm:$0xff]  }
 0x1c0   :  { %5730 = vmatprep.subr.bf16.mxu1 %v6543_v15  ;;  %4672 = vmatprep.mubr.bf16.mxu0 %v6818_v41  ;;  %v6558_v41 = vld [vmem:[#allocation2 + $0x3f8] ss:$12 sps:$4 sm:$0xff]  }
 0x1c1   :  { %4713 = vmatprep.mubr.bf16.mxu1 %v6822_v43  ;;  %v6559_v43 = vld [vmem:[#allocation2 + $0x578] ss:$12 sps:$4 sm:$0xff]  }
 0x1c2   :  { %5709 = vmatpush3.bf16.msra.mxu0 %v6544_v47  ;;  %v6592_v14 = vld [vmem:[#allocation2 + $0x638] ss:$12 sps:$4 sm:$0xff]   ;;  %v6594_v47 = vld [vmem:[#allocation2 + $0x6e0] ss:$12 sps:$4 sm:$0xff]  }
 0x1c3   :  { %5731 = vmatpush3.bf16.msra.mxu1 %v6545_v50  ;;  %5710 = vmatprep.subr.bf16.mxu0 %v6546_v16  ;;  %v6593_v15 = vld [vmem:[#allocation2 + $0x7b8] ss:$12 sps:$4 sm:$0xff]   ;;  %v6595_v50 = vld [vmem:[#allocation2 + $0x860] ss:$12 sps:$4 sm:$0xff]  }
 0x1c4   :  { %5732 = vmatprep.subr.bf16.mxu1 %v6547_v17  ;;  %v6596_v16 = vld [vmem:[#allocation2 + $0x620] ss:$12 sps:$4 sm:$0xff]  }
 0x1c5   :  { %v6597_v17 = vld [vmem:[#allocation2 + $0x7a0] ss:$12 sps:$4 sm:$0xff]  }
 0x1c6   :  { %5711 = vmatpush3.bf16.msra.mxu0 %v6548_v18  ;;  %v6598_v18 = vld [vmem:[#allocation2 + $0x6c8] ss:$12 sps:$4 sm:$0xff]  }
 0x1c7   :  { %5733 = vmatpush3.bf16.msra.mxu1 %v6549_v19  ;;  %5712 = vmatprep.subr.bf16.mxu0 %v6550_v22  ;;  %v6599_v19 = vld [vmem:[#allocation2 + $0x848] ss:$12 sps:$4 sm:$0xff]  }
 0x1c8   :  { %5734 = vmatprep.subr.bf16.mxu1 %v6551_v8  ;;  %v6600_v22 = vld [vmem:[#allocation2 + $0x608] ss:$12 sps:$4 sm:$0xff]  }
 0x1c9   :  { %v6601_v8 = vld [vmem:[#allocation2 + $0x788] ss:$12 sps:$4 sm:$0xff]  }
 0x1ca   :  { %5713 = vmatpush3.bf16.msra.mxu0 %v6552_v9  ;;  %v6602_v9 = vld [vmem:[#allocation2 + $0xa70] ss:$12 sps:$4 sm:$0xff]  }
 0x1cb   :  { %5735 = vmatpush3.bf16.msra.mxu1 %v6553_v25  ;;  %5714 = vmatprep.subr.bf16.mxu0 %v6554_v26  ;;  %v6603_v25 = vld [vmem:[#allocation2 + $0xbf0] ss:$12 sps:$4 sm:$0xff]  }
 0x1cc   :  { %5736 = vmatprep.subr.bf16.mxu1 %v6555_v27  ;;  %v6604_v26 = vld [vmem:[#allocation2 + $0x9b0] ss:$12 sps:$4 sm:$0xff]  }
 0x1cd   :  { %v6605_v27 = vld [vmem:[#allocation2 + $0xb30] ss:$12 sps:$4 sm:$0xff]  }
 0x1ce   :  { %5715 = vmatpush3.bf16.msra.mxu0 %v6556_v32  ;;  %v6606_v32 = vld [vmem:[#allocation2 + $0xa58] ss:$12 sps:$4 sm:$0xff]  }
 0x1cf   :  { %5737 = vmatpush3.bf16.msra.mxu1 %v6557_v34  ;;  %5716 = vmatprep.subr.bf16.mxu0 %v6558_v41  ;;  %v6607_v34 = vld [vmem:[#allocation2 + $0xbd8] ss:$12 sps:$4 sm:$0xff]  }
 0x1d0   :  { %5738 = vmatprep.subr.bf16.mxu1 %v6559_v43  ;;  %v6608_v41 = vld [vmem:[#allocation2 + $0x998] ss:$12 sps:$4 sm:$0xff]  }
 0x1d1   :  { %v6609_v43 = vld [vmem:[#allocation2 + $0xb18] ss:$12 sps:$4 sm:$0xff]  }
 0x1d2   :  { %5717 = vmatpush3.bf16.msra.mxu0 %v6560_v40  ;;  %v6610_v40 = vld [vmem:[#allocation2 + $0xa40] ss:$12 sps:$4 sm:$0xff]  }
 0x1d3   :  { %5739 = vmatpush3.bf16.msra.mxu1 %v6561_v42  ;;  %5718 = vmatprep.subr.bf16.mxu0 %v6562_v52  ;;  %v6611_v42 = vld [vmem:[#allocation2 + $0xbc0] ss:$12 sps:$4 sm:$0xff]  }
 0x1d4   :  { %5740 = vmatprep.subr.bf16.mxu1 %v6563_v31  ;;  %v6612_v52 = vld [vmem:[#allocation2 + $0x980] ss:$12 sps:$4 sm:$0xff]  }
 0x1d5   :  { %v6613_v31 = vld [vmem:[#allocation2 + $0xb00] ss:$12 sps:$4 sm:$0xff]  }
 0x1d6   :  { %5719 = vmatpush3.bf16.msra.mxu0 %v6564_v36  ;;  %v6616_v36 = vld [vmem:[#allocation2 + $0x968] ss:$12 sps:$4 sm:$0xff]  }
 0x1d7   :  { %5741 = vmatpush3.bf16.msra.mxu1 %v6565_v37  ;;  %5720 = vmatprep.subr.bf16.mxu0 %v6566_v38  ;;  %v6617_v37 = vld [vmem:[#allocation2 + $0xae8] ss:$12 sps:$4 sm:$0xff]   ;;  %v6618_v38 = vld [vmem:[#allocation2 + $0xa10] ss:$12 sps:$4 sm:$0xff]  }
 0x1d8   :  { %5742 = vmatprep.subr.bf16.mxu1 %v6567_v39  ;;  %v6619_v39 = vld [vmem:[#allocation2 + $0xb90] ss:$12 sps:$4 sm:$0xff]  }
 0x1da   :  { %5721 = vmatpush3.bf16.msra.mxu0 %v6568_v45  ;;  %v6622_v45 = vld [vmem:[#allocation2 + $0x9f8] ss:$12 sps:$4 sm:$0xff]  }
 0x1db   :  { %5743 = vmatpush3.bf16.msra.mxu1 %v6569_v51  ;;  %5750 = vmatprep.subr.bf16.mxu0 %v6570_v56  ;;  %v6623_v51 = vld [vmem:[#allocation2 + $0xb78] ss:$12 sps:$4 sm:$0xff]  }
 0x1dc   :  { %5772 = vmatprep.subr.bf16.mxu1 %v6571_v57  ;;  %v6624_v56 = vld [vmem:[#allocation2 + $0x938] ss:$12 sps:$4 sm:$0xff]  }
 0x1dd   :  { %4673 = vmatmul.mubr.bf16.vlgmr.msra.gmra.mxu0 %v6828_v20  ;;  %v6582_v20 = vld [vmem:[#allocation2 + $0x728] ss:$12 sps:$4 sm:$0xff]   ;;  %v6625_v57 = vld [vmem:[#allocation2 + $0xab8] ss:$12 sps:$4 sm:$0xff]  }
 0x1de   :  { %4714 = vmatmul.mubr.bf16.vlgmr.msra.gmra.mxu1 %v6832_v21  ;;  %5751 = vmatpush3.bf16.msra.mxu0 %v6572_v53  ;;  %v6584_v21 = vld [vmem:[#allocation2 + $0x668] ss:$12 sps:$4 sm:$0xff]   ;;  %v6626_v53 = vld [vmem:[#allocation2 + $0x9e0] ss:$12 sps:$4 sm:$0xff]  }
 0x1df   :  { %5773 = vmatpush3.bf16.msra.mxu1 %v6573_v55  ;;  %5752 = vmatprep.subr.bf16.mxu0 %v6574_v58  ;;  %v6627_v55 = vld [vmem:[#allocation2 + $0xb60] ss:$12 sps:$4 sm:$0xff]  }
 0x1e0   :  { %5774 = vmatprep.subr.bf16.mxu1 %v6575_v7  ;;  %4754 = vmatprep.mubr.bf16.mxu0 %v6858_v33  ;;  %v6588_v33 = vld [vmem:[#allocation2 + $0x650] ss:$12 sps:$4 sm:$0xff]   ;;  %v6628_v58 = vld [vmem:[#allocation2 + $0x920] ss:$12 sps:$4 sm:$0xff]  }
 0x1e1   :  { %4795 = vmatprep.mubr.bf16.mxu1 %v6862_v35  ;;  %v6589_v35 = vld [vmem:[#allocation2 + $0x7d0] ss:$12 sps:$4 sm:$0xff]   ;;  %v6629_v7 = vld [vmem:[#allocation2 + $0xaa0] ss:$12 sps:$4 sm:$0xff]  }
 0x1e2   :  { %5753 = vmatpush3.bf16.msra.mxu0 %v6576_v12  ;;  %v6630_v12 = vld [vmem:[#allocation2 + $0x9c8] ss:$12 sps:$4 sm:$0xff]  }
 0x1e3   :  { %5775 = vmatpush3.bf16.msra.mxu1 %v6577_v59  ;;  %5754 = vmatprep.subr.bf16.mxu0 %v6578_v60  ;;  %v6631_v59 = vld [vmem:[#allocation2 + $0xb48] ss:$12 sps:$4 sm:$0xff]  }
 0x1e4   :  { %5776 = vmatprep.subr.bf16.mxu1 %v6579_v61  ;;  %v6632_v60 = vld [vmem:[#allocation2 + $0x908] ss:$12 sps:$4 sm:$0xff]  }
 0x1e5   :  { %v6633_v61 = vld [vmem:[#allocation2 + $0xa88] ss:$12 sps:$4 sm:$0xff]  }
 0x1e6   :  { %5755 = vmatpush3.bf16.msra.mxu0 %v6580_v62  ;;  %v7010_v62 = vpop.f32.mrf.mxu0 }
 0x1e7   :  { %5777 = vmatpush3.bf16.msra.mxu1 %v6581_v63  ;;  %5756 = vmatprep.subr.bf16.mxu0 %v6582_v20  ;;  %v7012_v63 = vpop.f32.mrf.mxu1  ;;  %v6634_v20 = vld [vmem:[#allocation2 + $0xd70] ss:$12 sps:$4 sm:$0xff]  }
 0x1e8   :  { %5778 = vmatprep.subr.bf16.mxu1 %v6583_v0  ;;  %v6635_v0 = vld [vmem:[#allocation2 + $0xef0] ss:$12 sps:$4 sm:$0xff]  }
 0x1ea   :  { %5757 = vmatpush3.bf16.msra.mxu0 %v6584_v21  ;;  %v6636_v21 = vld [vmem:[#allocation2 + $0xcb0] ss:$12 sps:$4 sm:$0xff]  }
 0x1eb   :  { %5779 = vmatpush3.bf16.msra.mxu1 %v6585_v1  ;;  %5758 = vmatprep.subr.bf16.mxu0 %v6586_v2  ;;  %v6637_v1 = vld [vmem:[#allocation2 + $0xe30] ss:$12 sps:$4 sm:$0xff]   ;;  %v7014_v2 = vpop.f32.mrf.mxu0 }
 0x1ec   :  { %5780 = vmatprep.subr.bf16.mxu1 %v6587_v3  ;;  %v7016_v3 = vpop.f32.mrf.mxu1 }
 0x1ee   :  { %5759 = vmatpush3.bf16.msra.mxu0 %v6588_v33  ;;  %v6638_v33 = vld [vmem:[#allocation2 + $0xd58] ss:$12 sps:$4 sm:$0xff]  }
 0x1ef   :  { %5781 = vmatpush3.bf16.msra.mxu1 %v6589_v35  ;;  %5760 = vmatprep.subr.bf16.mxu0 %v6590_v5  ;;  %v6639_v35 = vld [vmem:[#allocation2 + $0xed8] ss:$12 sps:$4 sm:$0xff]  }
 0x1f0   :  { %5782 = vmatprep.subr.bf16.mxu1 %v6591_v13  ;;  %v6640_v5 = vld [vmem:[#allocation2 + $0xc98] ss:$12 sps:$4 sm:$0xff]  }
 0x1f1   :  { %v6641_v13 = vld [vmem:[#allocation2 + $0xe18] ss:$12 sps:$4 sm:$0xff]  }
 0x1f2   :  { %5761 = vmatpush3.bf16.msra.mxu0 %v6592_v14  ;;  %v7020_v14 = vpop.f32.mrf.mxu0 }
 0x1f3   :  { %5783 = vmatpush3.bf16.msra.mxu1 %v6593_v15  ;;  %5762 = vmatprep.subr.bf16.mxu0 %v6594_v47  ;;  %v7022_v15 = vpop.f32.mrf.mxu1  ;;  %v6642_v47 = vld [vmem:[#allocation2 + $0xd40] ss:$12 sps:$4 sm:$0xff]  }
 0x1f4   :  { %5784 = vmatprep.subr.bf16.mxu1 %v6595_v50  ;;  %v6643_v50 = vld [vmem:[#allocation2 + $0xec0] ss:$12 sps:$4 sm:$0xff]  }
 0x1f6   :  { %5763 = vmatpush3.bf16.msra.mxu0 %v6596_v16  ;;  %v7026_v16 = vpop.f32.mrf.mxu0 }
 0x1f7   :  { %5785 = vmatpush3.bf16.msra.mxu1 %v6597_v17  ;;  %5764 = vmatprep.subr.bf16.mxu0 %v6598_v18  ;;  %v7028_v17 = vpop.f32.mrf.mxu1  ;;  %v6646_v18 = vld [vmem:[#allocation2 + $0xd28] ss:$12 sps:$4 sm:$0xff]  }
 0x1f8   :  { %5786 = vmatprep.subr.bf16.mxu1 %v6599_v19  ;;  %v6647_v19 = vld [vmem:[#allocation2 + $0xea8] ss:$12 sps:$4 sm:$0xff]  }
 0x1fa   :  { %5765 = vmatpush3.bf16.msra.mxu0 %v6600_v22  ;;  %v7030_v22 = vpop.f32.mrf.mxu0 }
 0x1fb   :  { %5787 = vmatpush3.bf16.msra.mxu1 %v6601_v8  ;;  %5794 = vmatprep.subr.bf16.mxu0 %v6602_v9  ;;  %v7032_v8 = vpop.f32.mrf.mxu1  ;;  %v6650_v9 = vld [vmem:[#allocation2 + $0xd10] ss:$12 sps:$4 sm:$0xff]  }
 0x1fc   :  { %5816 = vmatprep.subr.bf16.mxu1 %v6603_v25  ;;  %v6651_v25 = vld [vmem:[#allocation2 + $0xe90] ss:$12 sps:$4 sm:$0xff]  }
 0x1fd   :  { %4755 = vmatmul.mubr.bf16.vlgmr.msra.gmra.mxu0 %v6883_v48  ;;  %v6614_v48 = vld [vmem:[#allocation2 + $0xa28] ss:$12 sps:$4 sm:$0xff]  }
 0x1fe   :  { %4796 = vmatmul.mubr.bf16.vlgmr.msra.gmra.mxu1 %v6887_v49  ;;  %5795 = vmatpush3.bf16.msra.mxu0 %v6604_v26  ;;  %v6615_v49 = vld [vmem:[#allocation2 + $0xba8] ss:$12 sps:$4 sm:$0xff]   ;;  %v7034_v26 = vpop.f32.mrf.mxu0 }
 0x1ff   :  { %5817 = vmatpush3.bf16.msra.mxu1 %v6605_v27  ;;  %5796 = vmatprep.subr.bf16.mxu0 %v6606_v32  ;;  %v7036_v27 = vpop.f32.mrf.mxu1  ;;  %v6652_v32 = vld [vmem:[#allocation2 + $0xc50] ss:$12 sps:$4 sm:$0xff]  }
 0x200   :  { %5818 = vmatprep.subr.bf16.mxu1 %v6607_v34  ;;  %4836 = vmatprep.mubr.bf16.mxu0 %v6896_v28  ;;  %v6620_v28 = vld [vmem:[#allocation2 + $0x950] ss:$12 sps:$4 sm:$0xff]  }
 0x201   :  { %4877 = vmatprep.mubr.bf16.mxu1 %v6900_v29  ;;  %v6621_v29 = vld [vmem:[#allocation2 + $0xad0] ss:$12 sps:$4 sm:$0xff]  }
 0x202   :  { %5797 = vmatpush3.bf16.msra.mxu0 %v6608_v41  ;;  %v6653_v34 = vld [vmem:[#allocation2 + $0xdd0] ss:$12 sps:$4 sm:$0xff]   ;;  %v6654_v41 = vld [vmem:[#allocation2 + $0xcf8] ss:$12 sps:$4 sm:$0xff]  }
 0x203   :  { %5819 = vmatpush3.bf16.msra.mxu1 %v6609_v43  ;;  %5798 = vmatprep.subr.bf16.mxu0 %v6610_v40  ;;  %v6655_v43 = vld [vmem:[#allocation2 + $0xe78] ss:$12 sps:$4 sm:$0xff]   ;;  %v7038_v40 = vpop.f32.mrf.mxu0 }
 0x204   :  { %5820 = vmatprep.subr.bf16.mxu1 %v6611_v42  ;;  %v7040_v42 = vpop.f32.mrf.mxu1 }
 0x206   :  { %5799 = vmatpush3.bf16.msra.mxu0 %v6612_v52  ;;  %v6656_v52 = vld [vmem:[#allocation2 + $0xc38] ss:$12 sps:$4 sm:$0xff]  }
 0x207   :  { %5821 = vmatpush3.bf16.msra.mxu1 %v6613_v31  ;;  %5800 = vmatprep.subr.bf16.mxu0 %v6614_v48  ;;  %v6657_v31 = vld [vmem:[#allocation2 + $0xdb8] ss:$12 sps:$4 sm:$0xff]   ;;  %v6658_v48 = vld [vmem:[#allocation2 + $0xce0] ss:$12 sps:$4 sm:$0xff]  }
 0x208   :  { %5822 = vmatprep.subr.bf16.mxu1 %v6615_v49  ;;  %v6659_v49 = vld [vmem:[#allocation2 + $0xe60] ss:$12 sps:$4 sm:$0xff]  }
 0x20a   :  { %5801 = vmatpush3.bf16.msra.mxu0 %v6616_v36  ;;  %v835_v36 = vlaneseq }
 0x20b   :  { %5823 = vmatpush3.bf16.msra.mxu1 %v6617_v37  ;;  %5802 = vmatprep.subr.bf16.mxu0 %v6618_v38  ;;  %v7042_v37 = vpop.f32.mrf.mxu0  ;;  %v7044_v38 = vpop.f32.mrf.mxu1 }
 0x20c   :  { %5824 = vmatprep.subr.bf16.mxu1 %v6619_v39  ;;  %v6660_v39 = vld [vmem:[#allocation2 + $0xc20] ss:$12 sps:$4 sm:$0xff]  }
 0x20e   :  { %5803 = vmatpush3.bf16.msra.mxu0 %v6620_v28  ;;  %v6661_v28 = vld [vmem:[#allocation2 + $0xda0] ss:$12 sps:$4 sm:$0xff]  }
 0x20f   :  { %5825 = vmatpush3.bf16.msra.mxu1 %v6621_v29  ;;  %5804 = vmatprep.subr.bf16.mxu0 %v6622_v45  ;;  %v7046_v29 = vpop.f32.mrf.mxu0  ;;  %v7048_v45 = vpop.f32.mrf.mxu1 }
 0x210   :  { %5826 = vmatprep.subr.bf16.mxu1 %v6623_v51  ;;  %v6662_v51 = vld [vmem:[#allocation2 + $0xcc8] ss:$12 sps:$4 sm:$0xff]  }
 0x212   :  { %5805 = vmatpush3.bf16.msra.mxu0 %v6624_v56  ;;  %v6663_v56 = vld [vmem:[#allocation2 + $0xe48] ss:$12 sps:$4 sm:$0xff]  }
 0x213   :  { %5827 = vmatpush3.bf16.msra.mxu1 %v6625_v57  ;;  %5806 = vmatprep.subr.bf16.mxu0 %v6626_v53  ;;  %v7050_v57 = vshrl.u32 %v835_v36, 7  ;;  %v6664_v53 = vld [vmem:[#allocation2 + $0xc08] ss:$12 sps:$4 sm:$0xff]   ;;  %v6682_v36 = vld [vmem:[#allocation2 + $0x1010] ss:$12 sps:$4 sm:$0xff]  }
 0x214   :  { %5828 = vmatprep.subr.bf16.mxu1 %v6627_v55  ;;  %v6665_v55 = vld [vmem:[#allocation2 + $0xd88] ss:$12 sps:$4 sm:$0xff]  }
 0x216   :  { %5807 = vmatpush3.bf16.msra.mxu0 %v6628_v58  ;;  %v7052_v58 = vpop.f32.mrf.mxu0 }
 0x217   :  { %5829 = vmatpush3.bf16.msra.mxu1 %v6629_v7  ;;  %5808 = vmatprep.subr.bf16.mxu0 %v6630_v12  ;;  %v7054_v7 = vpop.f32.mrf.mxu1  ;;  %v6666_v12 = vld [vmem:[#allocation2 + $0x1070] ss:$12 sps:$4 sm:$0xff]  }
 0x218   :  { %5830 = vmatprep.subr.bf16.mxu1 %v6631_v59  ;;  %v6667_v59 = vld [vmem:[#allocation2 + $0x11f0] ss:$12 sps:$4 sm:$0xff]  }
 0x21a   :  { %5809 = vmatpush3.bf16.msra.mxu0 %v6632_v60  ;;  %v837_v60 = vsub.s32 0, %v7050_v57 }
 0x21b   :  { %5831 = vmatpush3.bf16.msra.mxu1 %v6633_v61  ;;  %5838 = vmatprep.subr.bf16.mxu0 %v6634_v20  ;;  %v7057_v61 = vld [vmem:[#allocation4] sm:$0x7]  ;;  %v841_v20 = vsub.s32 1, %v7050_v57 }
 0x21c   :  { %5860 = vmatprep.subr.bf16.mxu1 %v6635_v0  ;;  %v6668_v0 = vld [vmem:[#allocation2 + $0xfb0] ss:$12 sps:$4 sm:$0xff]  }
 0x21d   :  { %4837 = vmatmul.mubr.bf16.vlgmr.msra.gmra.mxu0 %v6923_v10  ;;  %v6644_v10 = vld [vmem:[#allocation2 + $0xc80] ss:$12 sps:$4 sm:$0xff]  }
 0x21e   :  { %4878 = vmatmul.mubr.bf16.vlgmr.msra.gmra.mxu1 %v6927_v11  ;;  %5839 = vmatpush3.bf16.msra.mxu0 %v6636_v21  ;;  %v6645_v11 = vld [vmem:[#allocation2 + $0xe00] ss:$12 sps:$4 sm:$0xff]   ;;  %v6669_v21 = vld [vmem:[#allocation2 + $0x1130] ss:$12 sps:$4 sm:$0xff]  }
 0x21f   :  { %5861 = vmatpush3.bf16.msra.mxu1 %v6637_v1  ;;  %5840 = vmatprep.subr.bf16.mxu0 %v6638_v33  ;;  %v7060_v1 = vpop.f32.mrf.mxu0  ;;  %v7062_v33 = vpop.f32.mrf.mxu1 }
 0x220   :  { %5862 = vmatprep.subr.bf16.mxu1 %v6639_v35  ;;  %4918 = vmatprep.mubr.bf16.mxu0 %v6936_v44  ;;  %v6648_v44 = vld [vmem:[#allocation2 + $0xc68] ss:$12 sps:$4 sm:$0xff]   ;;  %v6670_v35 = vld [vmem:[#allocation2 + $0x1058] ss:$12 sps:$4 sm:$0xff]  }
 0x221   :  { %4959 = vmatprep.mubr.bf16.mxu1 %v6940_v46  ;;  %v6649_v46 = vld [vmem:[#allocation2 + $0xde8] ss:$12 sps:$4 sm:$0xff]  }
 0x222   :  { %5841 = vmatpush3.bf16.msra.mxu0 %v6640_v5  ;;  %v6671_v5 = vld [vmem:[#allocation2 + $0x11d8] ss:$12 sps:$4 sm:$0xff]  }
 0x223   :  { %5863 = vmatpush3.bf16.msra.mxu1 %v6641_v13  ;;  %5842 = vmatprep.subr.bf16.mxu0 %v6642_v47  ;;  %v838_v13 = vrot.slane %v7057_v61, %v837_v60  ;;  %v842_v47 = vrot.slane %v7057_v61, %v841_v20  ;;  %v6688_v20 = vld [vmem:[#allocation2 + $0xf38] ss:$12 sps:$4 sm:$0xff]  }
 0x224   :  { %5864 = vmatprep.subr.bf16.mxu1 %v6643_v50  ;;  %v6672_v50 = vld [vmem:[#allocation2 + $0xf98] ss:$12 sps:$4 sm:$0xff]  }
 0x226   :  { %5843 = vmatpush3.bf16.msra.mxu0 %v6644_v10  ;;  %v6673_v10 = vld [vmem:[#allocation2 + $0x1118] ss:$12 sps:$4 sm:$0xff]  }
 0x227   :  { %5865 = vmatpush3.bf16.msra.mxu1 %v6645_v11  ;;  %5844 = vmatprep.subr.bf16.mxu0 %v6646_v18  ;;  %v7068_v11 = vpop.f32.mrf.mxu0  ;;  %v7070_v18 = vpop.f32.mrf.mxu1 }
 0x228   :  { %5866 = vmatprep.subr.bf16.mxu1 %v6647_v19  ;;  %v6674_v19 = vld [vmem:[#allocation2 + $0x1040] ss:$12 sps:$4 sm:$0xff]  }
 0x22a   :  { %5845 = vmatpush3.bf16.msra.mxu0 %v6648_v44  ;;  %v6675_v44 = vld [vmem:[#allocation2 + $0x11c0] ss:$12 sps:$4 sm:$0xff]  }
 0x22b   :  { %5867 = vmatpush3.bf16.msra.mxu1 %v6649_v46  ;;  %5846 = vmatprep.subr.bf16.mxu0 %v6650_v9  ;;  %v4077_v46 = vadd.f32 %v7010_v62, %v838_v13  ;;  %v4079_v9 = vadd.f32 %v7014_v2, %v842_v47 }
 0x22c   :  { %5868 = vmatprep.subr.bf16.mxu1 %v6651_v25  ;;  %v6676_v25 = vld [vmem:[#allocation2 + $0xf80] ss:$12 sps:$4 sm:$0xff]  }
 0x22d   :  { %v4120_v62 = vadd.f32 %v7012_v63, %v4077_v46  ;;  %v6694_v46 = vld [vmem:[#allocation2 + $0xfc8] ss:$12 sps:$4 sm:$0xff]  }
 0x22e   :  { %5847 = vmatpush3.bf16.msra.mxu0 %v6652_v32  ;;  %v6677_v32 = vld [vmem:[#allocation2 + $0x1100] ss:$12 sps:$4 sm:$0xff]  }
 0x22f   :  { %5869 = vmatpush3.bf16.msra.mxu1 %v6653_v34  ;;  %5848 = vmatprep.subr.bf16.mxu0 %v6654_v41  ;;  %v6678_v34 = vld [vmem:[#allocation2 + $0x1028] ss:$12 sps:$4 sm:$0xff]   ;;  %v4163_v2 = vadd.f32 %v7030_v22, %v4120_v62 }
 0x230   :  { %5870 = vmatprep.subr.bf16.mxu1 %v6655_v43  ;;  %v6679_v41 = vld [vmem:[#allocation2 + $0x11a8] ss:$12 sps:$4 sm:$0xff]  }
 0x232   :  { %5849 = vmatpush3.bf16.msra.mxu0 %v6656_v52  ;;  %v4122_v52 = vadd.f32 %v7016_v3, %v4079_v9 }
 0x233   :  { %5871 = vmatpush3.bf16.msra.mxu1 %v6657_v31  ;;  %5850 = vmatprep.subr.bf16.mxu0 %v6658_v48  ;;  %v4083_v31 = vadd.f32 %v7026_v16, %v842_v47  ;;  %v6680_v48 = vld [vmem:[#allocation2 + $0xf68] ss:$12 sps:$4 sm:$0xff]   ;;  %v4206_v16 = vadd.f32 %v7032_v8, %v4163_v2 }
 0x234   :  { %5872 = vmatprep.subr.bf16.mxu1 %v6659_v49  ;;  %v6681_v49 = vld [vmem:[#allocation2 + $0x10e8] ss:$12 sps:$4 sm:$0xff]  }
 0x235   :  { %v4126_v3 = vadd.f32 %v7028_v17, %v4083_v31 }
 0x236   :  { %5851 = vmatpush3.bf16.msra.mxu0 %v6660_v39  ;;  %v6683_v39 = vld [vmem:[#allocation2 + $0x1190] ss:$12 sps:$4 sm:$0xff]  }
 0x237   :  { %5873 = vmatpush3.bf16.msra.mxu1 %v6661_v28  ;;  %5852 = vmatprep.subr.bf16.mxu0 %v6662_v51 }
 0x238   :  { %5874 = vmatprep.subr.bf16.mxu1 %v6663_v56  ;;  %v6684_v56 = vld [vmem:[#allocation2 + $0xf50] ss:$12 sps:$4 sm:$0xff]  }
 0x23a   :  { %5853 = vmatpush3.bf16.msra.mxu0 %v6664_v53  ;;  %v6685_v53 = vld [vmem:[#allocation2 + $0x10d0] ss:$12 sps:$4 sm:$0xff]  }
 0x23b   :  { %5875 = vmatpush3.bf16.msra.mxu1 %v6665_v55  ;;  %5882 = vmatprep.subr.bf16.mxu0 %v6666_v12  ;;  %v6686_v55 = vld [vmem:[#allocation2 + $0xff8] ss:$12 sps:$4 sm:$0xff]  }
 0x23c   :  { %5904 = vmatprep.subr.bf16.mxu1 %v6667_v59  ;;  %v6687_v12 = vld [vmem:[#allocation2 + $0x1178] ss:$12 sps:$4 sm:$0xff]   ;;  %v4249_v59 = vadd.f32 %v7046_v29, %v4206_v16 }
 0x23d   :  { %4919 = vmatmul.mubr.bf16.vlgmr.msra.gmra.mxu0 %v6963_v54  ;;  %v7075_v54 = vpop.f32.mrf.mxu0 }
 0x23e   :  { %4960 = vmatmul.mubr.bf16.vlgmr.msra.gmra.mxu1 %v6967_v30  ;;  %5883 = vmatpush3.bf16.msra.mxu0 %v6668_v0  ;;  %v7077_v30 = vpop.f32.mrf.mxu1  ;;  %v6689_v0 = vld [vmem:[#allocation2 + $0x10b8] ss:$12 sps:$4 sm:$0xff]   ;;  %v4292_v29 = vadd.f32 %v7048_v45, %v4249_v59 }
 0x23f   :  { %5905 = vmatpush3.bf16.msra.mxu1 %v6669_v21  ;;  %5884 = vmatprep.subr.bf16.mxu0 %v6670_v35  ;;  %v4336_v43 = vpop.f32.mrf.mxu0 }
 0x240   :  { %5906 = vmatprep.subr.bf16.mxu1 %v6671_v5  ;;  %5000 = vmatprep.mubr.bf16.mxu0 %v6976_v4  ;;  %v4081_v4 = vadd.f32 %v7020_v14, %v838_v13  ;;  %v4165_v14 = vadd.f32 %v7034_v26, %v4122_v52  ;;  %v4169_v26 = vadd.f32 %v7042_v37, %v4126_v3  ;;  %v6690_v5 = vld [vmem:[#allocation2 + $0xfe0] ss:$12 sps:$4 sm:$0xff]  }
 0x241   :  { %5041 = vmatprep.mubr.bf16.mxu1 %v6980_v6  ;;  %v7082_v6 = vpop.f32.mrf.mxu1  ;;  %v4338_v28 = vpop.f32.mrf.mxu0  ;;  %v4335_v47 = vadd.f32 %v7075_v54, %v4292_v29  ;;  %v6696_v54 = vld [vmem:[#allocation2 + $0xf08] ss:$12 sps:$4 sm:$0xff]  }
 0x242   :  { %5885 = vmatpush3.bf16.msra.mxu0 %v6672_v50  ;;  %v4124_v63 = vadd.f32 %v7022_v15, %v4081_v4  ;;  %v4208_v15 = vadd.f32 %v7036_v27, %v4165_v14  ;;  %v6691_v27 = vld [vmem:[#allocation2 + $0x1160] ss:$12 sps:$4 sm:$0xff]   ;;  %v4212_v37 = vadd.f32 %v7044_v38, %v4169_v26  ;;  %v6695_v38 = vld [vmem:[#allocation2 + $0x1148] ss:$12 sps:$4 sm:$0xff]  }
 0x243   :  { %5907 = vmatpush3.bf16.msra.mxu1 %v6673_v10  ;;  %5886 = vmatprep.subr.bf16.mxu0 %v6674_v19  ;;  %v4381_v51 = vpop.f32.mrf.mxu1  ;;  %v4340_v60 = vpop.f32.mrf.mxu0  ;;  %v6692_v50 = vld [vmem:[#allocation2 + $0xf20] ss:$12 sps:$4 sm:$0xff]  }
 0x244   :  { %5908 = vmatprep.subr.bf16.mxu1 %v6675_v44  ;;  %v4167_v22 = vadd.f32 %v7038_v40, %v4124_v63  ;;  %v4251_v40 = vadd.f32 %v7052_v58, %v4208_v15  ;;  %v4255_v58 = vadd.f32 %v7068_v11, %v4212_v37  ;;  %v6693_v10 = vld [vmem:[#allocation2 + $0x10a0] ss:$12 sps:$4 sm:$0xff]  }
 0x245   :  { %v4383_v17 = vpop.f32.mrf.mxu1  ;;  %v4420_v21 = vpop.f32.mrf.mxu0 }
 0x246   :  { %5887 = vmatpush3.bf16.msra.mxu0 %v6676_v25  ;;  %v4210_v8 = vadd.f32 %v7040_v42, %v4167_v22  ;;  %v4294_v42 = vadd.f32 %v7054_v7, %v4251_v40  ;;  %v4378_v7 = vadd.f32 %v7077_v30, %v4335_v47  ;;  %v6697_v25 = vld [vmem:[#allocation2 + $0x1088] ss:$12 sps:$4 sm:$0xff]  }
 0x247   :  { %5909 = vmatpush3.bf16.msra.mxu1 %v6677_v32  ;;  %5888 = vmatprep.subr.bf16.mxu0 %v6678_v34  ;;  %v4463_v35 = vpop.f32.mrf.mxu1  ;;  %v4422_v19 = vpop.f32.mrf.mxu0 }
 0x248   :  { %5910 = vmatprep.subr.bf16.mxu1 %v6679_v41  ;;  %v4253_v13 = vadd.f32 %v7060_v1, %v4210_v8  ;;  %v4337_v9 = vadd.f32 %v4336_v43, %v4294_v42  ;;  %v4298_v1 = vadd.f32 %v7070_v18, %v4255_v58  ;;  %v4421_v4 = vadd.f32 %v4420_v21, %v4378_v7 }
 0x249   :  { %v4465_v44 = vpop.f32.mrf.mxu1  ;;  %v4424_v32 = vpop.f32.mrf.mxu0 }
 0x24a   :  { %5889 = vmatpush3.bf16.msra.mxu0 %v6680_v48  ;;  %v4296_v45 = vadd.f32 %v7062_v33, %v4253_v13  ;;  %v4380_v41 = vadd.f32 %v7082_v6, %v4337_v9  ;;  %v4341_v62 = vadd.f32 %v4340_v60, %v4298_v1  ;;  %v4464_v31 = vadd.f32 %v4463_v35, %v4421_v4 }
 0x24b   :  { %5911 = vmatpush3.bf16.msra.mxu1 %v6681_v49  ;;  %5890 = vmatprep.subr.bf16.mxu0 %v6682_v36  ;;  %v4467_v34 = vpop.f32.mrf.mxu1  ;;  %v4426_v18 = vpop.f32.mrf.mxu0 }
 0x24c   :  { %5912 = vmatprep.subr.bf16.mxu1 %v6683_v39  ;;  %v4339_v11 = vadd.f32 %v4338_v28, %v4296_v45  ;;  %v4423_v33 = vadd.f32 %v4422_v19, %v4380_v41  ;;  %v4384_v30 = vadd.f32 %v4383_v17, %v4341_v62 }
 0x24d   :  { %v4469_v43 = vpop.f32.mrf.mxu1 }
 0x24e   :  { %5891 = vmatpush3.bf16.msra.mxu0 %v6684_v56  ;;  %v4382_v52 = vadd.f32 %v4381_v51, %v4339_v11  ;;  %v4466_v36 = vadd.f32 %v4465_v44, %v4423_v33  ;;  %v4427_v39 = vadd.f32 %v4426_v18, %v4384_v30 }
 0x24f   :  { %5913 = vmatpush3.bf16.msra.mxu1 %v6685_v53  ;;  %5892 = vmatprep.subr.bf16.mxu0 %v6686_v55 }
 0x250   :  { %5914 = vmatprep.subr.bf16.mxu1 %v6687_v12  ;;  %v4425_v2 = vadd.f32 %v4424_v32, %v4382_v52  ;;  %v4470_v56 = vadd.f32 %v4469_v43, %v4427_v39 }
 0x252   :  { %5893 = vmatpush3.bf16.msra.mxu0 %v6688_v20  ;;  %v4468_v28 = vadd.f32 %v4467_v34, %v4425_v2 }
 0x253   :  { %5915 = vmatpush3.bf16.msra.mxu1 %v6689_v0  ;;  %5894 = vmatprep.subr.bf16.mxu0 %v6690_v5 }
 0x254   :  { %5916 = vmatprep.subr.bf16.mxu1 %v6691_v27 }
 0x256   :  { %5895 = vmatpush3.bf16.msra.mxu0 %v6692_v50 }
 0x257   :  { %5917 = vmatpush3.bf16.msra.mxu1 %v6693_v10  ;;  %5896 = vmatprep.subr.bf16.mxu0 %v6694_v46 }
 0x258   :  { %5918 = vmatprep.subr.bf16.mxu1 %v6695_v38  ;;  %v845_v38 = vsub.s32 2, %v7050_v57 }
 0x25a   :  { %5897 = vmatpush3.bf16.msra.mxu0 %v6696_v54  ;;  %v846_v7 = vrot.slane %v7057_v61, %v845_v38 }
 0x25b   :  { %5919 = vmatpush3.bf16.msra.mxu1 %v6697_v25 }
 0x25d   :  { %v4506_v48 = vpop.f32.mrf.mxu0  ;;  %5001 = vmatmul.mubr.bf16.vlgmr.msra.gmra.mxu0 %v6988_v23 }
 0x25e   :  { %v4549_v49 = vpop.f32.mrf.mxu1  ;;  %5042 = vmatmul.mubr.bf16.vlgmr.msra.gmra.mxu1 %v6992_v24  ;;  %v4507_v6 = vadd.f32 %v4506_v48, %v4464_v31 }
 0x25f   :  { %v4508_v63 = vpop.f32.mrf.mxu0 }
 0x260   :  { %v4551_v14 = vpop.f32.mrf.mxu1  ;;  %v4550_v51 = vadd.f32 %v4549_v49, %v4507_v6  ;;  %v4509_v3 = vadd.f32 %v4508_v63, %v4466_v36 }
 0x261   :  { %v4510_v16 = vpop.f32.mrf.mxu0 }
 0x262   :  { %v4553_v22 = vpop.f32.mrf.mxu1  ;;  %5050 = vst [vmem:[%s7132_s3] sm:$0xff] %v4550_v51  ;;  %v4552_v53 = vadd.f32 %v4551_v14, %v4509_v3  ;;  %v4511_v55 = vadd.f32 %v4510_v16, %v4468_v28 }
 0x263   :  { %v4512_v23 = vpop.f32.mrf.mxu0 }
 0x264   :  { %5051 = vst [vmem:[%s7132_s3 + $0x8] sm:$0xff] %v4552_v53  ;;  %v4554_v24 = vadd.f32 %v4553_v22, %v4511_v55  ;;  %v4513_v12 = vadd.f32 %v4512_v23, %v4470_v56  ;;  %v4555_v15 = vpop.f32.mrf.mxu1 }
 0x266   :  { %5053 = vst [vmem:[%s7132_s3 + $0x18] sm:$0xff] %v4554_v24  ;;  %v4556_v26 = vadd.f32 %v4555_v15, %v4513_v12 }
 0x268   :  { %5054 = vst [vmem:[%s7132_s3 + $0x20] sm:$0xff] %v4556_v26 }
 0x27d   :  { %v5678_v59 = vpop.f32.mrf.mxu0 }
 0x27e   :  { %v5700_v60 = vpop.f32.mrf.mxu1 }
 0x27f   :  { %v5679_v17 = vpop.f32.mrf.mxu0 }
 0x280   :  { %v5701_v8 = vpop.f32.mrf.mxu1  ;;  %v5680_v11 = vadd.f32 %v5679_v17, %v5678_v59 }
 0x281   :  { %v5681_v40 = vpop.f32.mrf.mxu0  ;;  %v5702_v34 = vadd.f32 %v5701_v8, %v5700_v60 }
 0x282   :  { %v5703_v20 = vpop.f32.mrf.mxu1  ;;  %v4593_v32 = vadd.f32 %v5680_v11, %v846_v7 }
 0x283   :  { %v5682_v0 = vpop.f32.mrf.mxu0 }
 0x284   :  { %v5704_v21 = vpop.f32.mrf.mxu1  ;;  %v5683_v41 = vadd.f32 %v5682_v0, %v5681_v40  ;;  %v4634_v33 = vadd.f32 %v5702_v34, %v4593_v32 }
 0x285   :  { %v5705_v30 = vadd.f32 %v5704_v21, %v5703_v20 }
 0x286   :  { %v4596_v18 = vadd.f32 %v5683_v41, %v846_v7 }
 0x288   :  { %v4637_v49 = vadd.f32 %v5705_v30, %v4596_v18 }
 0x29d   :  { %v5722_v35 = vpop.f32.mrf.mxu0 }
 0x29e   :  { %v5744_v5 = vpop.f32.mrf.mxu1 }
 0x29f   :  { %v5723_v27 = vpop.f32.mrf.mxu0 }
 0x2a0   :  { %v5745_v37 = vpop.f32.mrf.mxu1  ;;  %v5724_v4 = vadd.f32 %v5723_v27, %v5722_v35 }
 0x2a1   :  { %v5725_v29 = vpop.f32.mrf.mxu0  ;;  %v5746_v57 = vadd.f32 %v5745_v37, %v5744_v5 }
 0x2a2   :  { %v5747_v13 = vpop.f32.mrf.mxu1  ;;  %v4675_v31 = vadd.f32 %v5724_v4, %v4634_v33 }
 0x2a3   :  { %v5726_v42 = vpop.f32.mrf.mxu0 }
 0x2a4   :  { %v5748_v58 = vpop.f32.mrf.mxu1  ;;  %v5727_v2 = vadd.f32 %v5726_v42, %v5725_v29  ;;  %v4716_v6 = vadd.f32 %v5746_v57, %v4675_v31 }
 0x2a5   :  { %v5749_v28 = vadd.f32 %v5748_v58, %v5747_v13 }
 0x2a6   :  { %v4678_v63 = vadd.f32 %v5727_v2, %v4637_v49 }
 0x2a8   :  { %v4719_v56 = vadd.f32 %v5749_v28, %v4678_v63 }
 0x2bd   :  { %v5766_v47 = vpop.f32.mrf.mxu0 }
 0x2be   :  { %v5788_v50 = vpop.f32.mrf.mxu1 }
 0x2bf   :  { %v5767_v10 = vpop.f32.mrf.mxu0 }
 0x2c0   :  { %v5789_v19 = vpop.f32.mrf.mxu1  ;;  %v5768_v36 = vadd.f32 %v5767_v10, %v5766_v47 }
 0x2c1   :  { %v5769_v44 = vpop.f32.mrf.mxu0  ;;  %v5790_v3 = vadd.f32 %v5789_v19, %v5788_v50 }
 0x2c2   :  { %v5791_v46 = vpop.f32.mrf.mxu1  ;;  %v4757_v51 = vadd.f32 %v5768_v36, %v4716_v6 }
 0x2c3   :  { %v5770_v45 = vpop.f32.mrf.mxu0 }
 0x2c4   :  { %v5792_v9 = vpop.f32.mrf.mxu1  ;;  %v5771_v16 = vadd.f32 %v5770_v45, %v5769_v44  ;;  %v4798_v23 = vadd.f32 %v5790_v3, %v4757_v51 }
 0x2c5   :  { %v5793_v15 = vadd.f32 %v5792_v9, %v5791_v46 }
 0x2c6   :  { %v4760_v24 = vadd.f32 %v5771_v16, %v4719_v56 }
 0x2c8   :  { %v4801_v8 = vadd.f32 %v5793_v15, %v4760_v24 }
 0x2dd   :  { %v5810_v1 = vpop.f32.mrf.mxu0 }
 0x2de   :  { %v5832_v54 = vpop.f32.mrf.mxu1 }
 0x2df   :  { %v5811_v25 = vpop.f32.mrf.mxu0 }
 0x2e0   :  { %v5833_v62 = vpop.f32.mrf.mxu1  ;;  %v5812_v53 = vadd.f32 %v5811_v25, %v5810_v1 }
 0x2e1   :  { %v5813_v52 = vpop.f32.mrf.mxu0  ;;  %v5834_v59 = vadd.f32 %v5833_v62, %v5832_v54 }
 0x2e2   :  { %v5835_v43 = vpop.f32.mrf.mxu1  ;;  %v4839_v26 = vadd.f32 %v5812_v53, %v4798_v23 }
 0x2e3   :  { %v5814_v48 = vpop.f32.mrf.mxu0 }
 0x2e4   :  { %v5836_v61 = vpop.f32.mrf.mxu1  ;;  %v5815_v60 = vadd.f32 %v5814_v48, %v5813_v52  ;;  %v4880_v0 = vadd.f32 %v5834_v59, %v4839_v26 }
 0x2e5   :  { %v5837_v5 = vadd.f32 %v5836_v61, %v5835_v43 }
 0x2e6   :  { %v4842_v21 = vadd.f32 %v5815_v60, %v4801_v8 }
 0x2e8   :  { %v4883_v58 = vadd.f32 %v5837_v5, %v4842_v21 }
 0x2fd   :  { %v5854_v39 = vpop.f32.mrf.mxu0 }
 0x2fe   :  { %v5876_v14 = vpop.f32.mrf.mxu1 }
 0x2ff   :  { %v5855_v22 = vpop.f32.mrf.mxu0 }
 0x300   :  { %v5877_v55 = vpop.f32.mrf.mxu1  ;;  %v5856_v40 = vadd.f32 %v5855_v22, %v5854_v39 }
 0x301   :  { %v5857_v12 = vpop.f32.mrf.mxu0  ;;  %v5878_v37 = vadd.f32 %v5877_v55, %v5876_v14 }
 0x302   :  { %v5879_v17 = vpop.f32.mrf.mxu1  ;;  %v4921_v27 = vadd.f32 %v5856_v40, %v4880_v0 }
 0x303   :  { %v5858_v20 = vpop.f32.mrf.mxu0 }
 0x304   :  { %v5880_v35 = vpop.f32.mrf.mxu1  ;;  %v5859_v29 = vadd.f32 %v5858_v20, %v5857_v12  ;;  %v4962_v10 = vadd.f32 %v5878_v37, %v4921_v27 }
 0x305   :  { %v5881_v45 = vadd.f32 %v5880_v35, %v5879_v17 }
 0x306   :  { %v4924_v19 = vadd.f32 %v5859_v29, %v4883_v58 }
 0x308   :  { %v4965_v54 = vadd.f32 %v5881_v45, %v4924_v19 }
 0x31d   :  { %v5898_v13 = vpop.f32.mrf.mxu0 }
 0x31e   :  { %v5920_v42 = vpop.f32.mrf.mxu1 }
 0x31f   :  { %v5899_v47 = vpop.f32.mrf.mxu0 }
 0x320   :  { %v5921_v50 = vpop.f32.mrf.mxu1  ;;  %v5900_v44 = vadd.f32 %v5899_v47, %v5898_v13 }
 0x321   :  { %v5901_v46 = vpop.f32.mrf.mxu0  ;;  %v5922_v1 = vadd.f32 %v5921_v50, %v5920_v42 }
 0x322   :  { %v5923_v38 = vpop.f32.mrf.mxu1  ;;  %v5003_v9 = vadd.f32 %v5900_v44, %v4962_v10 }
 0x323   :  { %v5902_v7 = vpop.f32.mrf.mxu0 }
 0x324   :  { %v5924_v11 = vpop.f32.mrf.mxu1  ;;  %v5044_v25 = vadd.f32 %v5922_v1, %v5003_v9  ;;  %v5903_v32 = vadd.f32 %v5902_v7, %v5901_v46 }
 0x325   :  { %v5925_v41 = vadd.f32 %v5924_v11, %v5923_v38 }
 0x326   :  { %5052 = vst [vmem:[%s7132_s3 + $0x10] sm:$0xff] %v5044_v25  ;;  %v5006_v34 = vadd.f32 %v5903_v32, %v4965_v54 }
 0x328   :  { %v5047_v62 = vadd.f32 %v5925_v41, %v5006_v34 }
 0x32a   :  { %5055 = vst [vmem:[%s7132_s3 + $0x28] sm:$0xff] %v5047_v62 }
 0x32b   :  { %5060 = vsyncpa [#allocation3], 1 }
 0x32c   :  { %5061 = vsyncpa [#allocation5], 1 }

</bundles_post_ra>
